<compile_context>
chip_gen: v7x
topology: tpu7x:2x2x1
jax: 0.10.0
libtpu: 0.0.40
codegen_flags: <defaults>
</compile_context>

<pallas_src>
import functools

import jax
import jax.numpy as jnp
from jax.experimental import pallas as pl
from jax.experimental.pallas import tpu as pltpu

COMPUTE_DTYPE = jnp.bfloat16   # MXU operand dtype; accumulation stays f32
LANE = 128
SUBLANE = 8
VMEM_LIMIT = 32 * 1024 * 1024  # safe scoped-VMEM budget on v5e/v6e/v7x


def _pick_tile(dim, preferred, align):
    """Largest tile <= preferred that divides dim and is align-aligned, else dim."""
    if dim <= preferred:
        return dim
    t = (min(preferred, dim) // align) * align
    t = max(t, align)
    while t > align and dim % t != 0:
        t -= align
    return t if dim % t == 0 else dim


# ----------------------------------------------------------------------------
# Tiled linear (used for the fused QKV projection)
# ----------------------------------------------------------------------------
def _linear_kernel(x_ref, w_ref, b_ref, o_ref, acc_ref):
    @pl.when(pl.program_id(2) == 0)
    def _init():
        acc_ref[...] = jnp.zeros_like(acc_ref)

    acc_ref[...] += jnp.dot(x_ref[...], w_ref[...],
                            preferred_element_type=jnp.float32)

    @pl.when(pl.program_id(2) == pl.num_programs(2) - 1)
    def _flush():
        o_ref[...] = (acc_ref[...] + b_ref[...].astype(jnp.float32)
                      ).astype(o_ref.dtype)


def linear(x, w, b, out_dtype=None, tm=256, tn=512, tk=1024):
    """x: [M, K] (bf16), w: [K, N] (bf16), b: [N] (f32) -> [M, N]."""
    M, K = x.shape
    N = w.shape[1]
    out_dtype = out_dtype or x.dtype
    tm = _pick_tile(M, tm, SUBLANE)
    tn = _pick_tile(N, tn, LANE)
    tk = _pick_tile(K, tk, LANE)          # full K when K <= 1024
    grid = (M // tm, N // tn, K // tk)
    cost = pl.CostEstimate(flops=2 * M * N * K, transcendentals=0,
                           bytes_accessed=2 * (M * K + K * N + M * N))
    return pl.pallas_call(
        _linear_kernel,
        out_shape=jax.ShapeDtypeStruct((M, N), out_dtype),
        grid=grid,
        in_specs=[
            pl.BlockSpec((tm, tk), lambda i, j, k: (i, k)),
            pl.BlockSpec((tk, tn), lambda i, j, k: (k, j)),
            pl.BlockSpec((1, tn), lambda i, j, k: (0, j)),
        ],
        out_specs=pl.BlockSpec((tm, tn), lambda i, j, k: (i, j)),
        scratch_shapes=[pltpu.VMEM((tm, tn), jnp.float32)],
        compiler_params=pltpu.CompilerParams(
            dimension_semantics=("parallel", "parallel", "arbitrary"),
            vmem_limit_bytes=VMEM_LIMIT),
        cost_estimate=cost,
    )(x, w, b.reshape(1, N))


# ----------------------------------------------------------------------------
# Linear + bias + residual + LayerNorm fused into the matmul flush
# (attention output projection; tn = full D so the flush sees whole rows)
# ----------------------------------------------------------------------------
def _linear_add_ln_kernel(x_ref, w_ref, b_ref, r_ref, g_ref, bt_ref, o_ref,
                          acc_ref, *, eps):
    @pl.when(pl.program_id(1) == 0)
    def _init():
        acc_ref[...] = jnp.zeros_like(acc_ref)

    acc_ref[...] += jnp.dot(x_ref[...], w_ref[...],
                            preferred_element_type=jnp.float32)

    @pl.when(pl.program_id(1) == pl.num_programs(1) - 1)
    def _flush():
        v = (acc_ref[...] + b_ref[...].astype(jnp.float32)
             + r_ref[...].astype(jnp.float32))
        mean = jnp.mean(v, axis=-1, keepdims=True)
        var = jnp.mean(jnp.square(v - mean), axis=-1, keepdims=True)
        n = (v - mean) * jax.lax.rsqrt(var + eps)
        o_ref[...] = (n * g_ref[...].astype(jnp.float32)
                      + bt_ref[...].astype(jnp.float32)).astype(o_ref.dtype)


def linear_add_ln(x, w, b, residual, gamma, beta, eps=1e-12,
                  out_dtype=None, tm=256, tk=1024):
    """LayerNorm(residual + x @ w + b) without HBM round trips for the sum."""
    M, K = x.shape
    N = w.shape[1]
    out_dtype = out_dtype or x.dtype
    tm = _pick_tile(M, tm, SUBLANE)
    tk = _pick_tile(K, tk, LANE)
    grid = (M // tm, K // tk)
    cost = pl.CostEstimate(flops=2 * M * N * K + 8 * M * N, transcendentals=0,
                           bytes_accessed=2 * (M * K + K * N + 2 * M * N))
    return pl.pallas_call(
        functools.partial(_linear_add_ln_kernel, eps=eps),
        out_shape=jax.ShapeDtypeStruct((M, N), out_dtype),
        grid=grid,
        in_specs=[
            pl.BlockSpec((tm, tk), lambda i, k: (i, k)),
            pl.BlockSpec((tk, N), lambda i, k: (k, 0)),
            pl.BlockSpec((1, N), lambda i, k: (0, 0)),
            pl.BlockSpec((tm, N), lambda i, k: (i, 0)),
            pl.BlockSpec((1, N), lambda i, k: (0, 0)),
            pl.BlockSpec((1, N), lambda i, k: (0, 0)),
        ],
        out_specs=pl.BlockSpec((tm, N), lambda i, k: (i, 0)),
        scratch_shapes=[pltpu.VMEM((tm, N), jnp.float32)],
        compiler_params=pltpu.CompilerParams(
            dimension_semantics=("parallel", "arbitrary"),
            vmem_limit_bytes=VMEM_LIMIT),
        cost_estimate=cost,
    )(x, w, b.reshape(1, N), residual, gamma.reshape(1, N), beta.reshape(1, N))


# ----------------------------------------------------------------------------
# Fused FFN: LayerNorm(x + GELU(x @ W1 + b1) @ W2 + b2)
# [M, d_ff] intermediate never touches HBM; residual is the x block itself
# ----------------------------------------------------------------------------
def _ffn_add_ln_kernel(x_ref, w1_ref, b1_ref, w2_ref, b2_ref, g_ref, bt_ref,
                       o_ref, acc_ref, *, eps):
    @pl.when(pl.program_id(1) == 0)
    def _init():
        acc_ref[...] = jnp.zeros_like(acc_ref)

    h = jnp.dot(x_ref[...], w1_ref[...], preferred_element_type=jnp.float32)
    # TODO(synk): reference may use exact erf-GELU; tanh approximation used here.
    h = jax.nn.gelu(h + b1_ref[...].astype(jnp.float32), approximate=True)
    acc_ref[...] += jnp.dot(h.astype(x_ref.dtype), w2_ref[...],
                            preferred_element_type=jnp.float32)

    @pl.when(pl.program_id(1) == pl.num_programs(1) - 1)
    def _flush():
        v = (acc_ref[...] + b2_ref[...].astype(jnp.float32)
             + x_ref[...].astype(jnp.float32))          # residual == FFN input
        mean = jnp.mean(v, axis=-1, keepdims=True)
        var = jnp.mean(jnp.square(v - mean), axis=-1, keepdims=True)
        n = (v - mean) * jax.lax.rsqrt(var + eps)
        o_ref[...] = (n * g_ref[...].astype(jnp.float32)
                      + bt_ref[...].astype(jnp.float32)).astype(o_ref.dtype)


def ffn_add_ln(x, w1, b1, w2, b2, gamma, beta, eps=1e-12, tm=1024, tf=256):
    """x: [M, D] -> LayerNorm(x + FFN(x)): [M, D]."""
    M, D = x.shape
    D_ff = w1.shape[1]
    tm = _pick_tile(M, tm, SUBLANE)   # big M tile: cut weight re-streaming 4x
    tf = _pick_tile(D_ff, tf, LANE)
    grid = (M // tm, D_ff // tf)
    cost = pl.CostEstimate(flops=4 * M * D * D_ff, transcendentals=M * D_ff,
                           bytes_accessed=2 * (2 * M * D + 2 * D * D_ff))
    return pl.pallas_call(
        functools.partial(_ffn_add_ln_kernel, eps=eps),
        out_shape=jax.ShapeDtypeStruct((M, D), x.dtype),
        grid=grid,
        in_specs=[
            pl.BlockSpec((tm, D), lambda i, f: (i, 0)),
            pl.BlockSpec((D, tf), lambda i, f: (0, f)),
            pl.BlockSpec((1, tf), lambda i, f: (0, f)),
            pl.BlockSpec((tf, D), lambda i, f: (f, 0)),
            pl.BlockSpec((1, D), lambda i, f: (0, 0)),
            pl.BlockSpec((1, D), lambda i, f: (0, 0)),
            pl.BlockSpec((1, D), lambda i, f: (0, 0)),
        ],
        out_specs=pl.BlockSpec((tm, D), lambda i, f: (i, 0)),
        scratch_shapes=[pltpu.VMEM((tm, D), jnp.float32)],
        compiler_params=pltpu.CompilerParams(
            dimension_semantics=("parallel", "arbitrary"),
            vmem_limit_bytes=VMEM_LIMIT),
        cost_estimate=cost,
    )(x, w1, b1.reshape(1, D_ff), w2, b2.reshape(1, D),
      gamma.reshape(1, D), beta.reshape(1, D))


# ----------------------------------------------------------------------------
# Row-tiled LayerNorm (embeddings only; encoder LNs are fused into matmuls)
# ----------------------------------------------------------------------------
def _ln_kernel(x_ref, g_ref, b_ref, o_ref, *, eps):
    v = x_ref[...].astype(jnp.float32)
    mean = jnp.mean(v, axis=-1, keepdims=True)
    var = jnp.mean(jnp.square(v - mean), axis=-1, keepdims=True)
    n = (v - mean) * jax.lax.rsqrt(var + eps)
    o_ref[...] = (n * g_ref[...] + b_ref[...]).astype(o_ref.dtype)


def layernorm(x, gamma, beta, eps=1e-12, out_dtype=None, tm=1024):
    M, D = x.shape
    out_dtype = out_dtype or x.dtype
    tm = _pick_tile(M, tm, SUBLANE)
    return pl.pallas_call(
        functools.partial(_ln_kernel, eps=eps),
        out_shape=jax.ShapeDtypeStruct((M, D), out_dtype),
        grid=(M // tm,),
        in_specs=[
            pl.BlockSpec((tm, D), lambda i: (i, 0)),
            pl.BlockSpec((1, D), lambda i: (0, 0)),
            pl.BlockSpec((1, D), lambda i: (0, 0)),
        ],
        out_specs=pl.BlockSpec((tm, D), lambda i: (i, 0)),
        compiler_params=pltpu.CompilerParams(
            dimension_semantics=("parallel",), vmem_limit_bytes=VMEM_LIMIT),
    )(x, gamma.reshape(1, D), beta.reshape(1, D))


# ----------------------------------------------------------------------------
# Multi-head self-attention: grid=(B, H/hpb), head-major DMA-sliced q/k/v,
# lane-dense [B, S, D] output (hpb heads grouped per step so the output block
# is >=128 lanes wide or covers the full model dim).
# Full [S, S] scores are fine for S <= ~128 (seq_len = 64 here).
# TODO(synk): switch to a KV-tiled online-softmax (flash) form if S >> 256.
# ----------------------------------------------------------------------------
def _heads_per_block(num_heads, head_dim):
    for hpb in range(1, num_heads + 1):
        if num_heads % hpb == 0 and (hpb * head_dim) % LANE == 0:
            return hpb
    return num_heads           # fallback: full model dim per step


def _attention_kernel(q_ref, k_ref, v_ref, mb_ref, o_ref, *, scale,
                      heads_per_block):
    S = q_ref.shape[2]
    # additive mask bias: broadcast hoisted out of the (tiny) per-head unroll
    mb = jnp.broadcast_to(mb_ref[0].astype(jnp.float32), (S, S))
    outs = []
    for j in range(heads_per_block):       # static unroll of 2 at d_model=512
        q = q_ref[0, j]                    # [S, dh] contiguous DMA'd slice
        k = k_ref[0, j]
        v = v_ref[0, j]
        s = jax.lax.dot_general(q, k, (((1,), (1,)), ((), ())),
                                preferred_element_type=jnp.float32)
        s = s * scale + mb
        s = s - jnp.max(s, axis=-1, keepdims=True)
        p = jnp.exp(s)
        p = p * pl.reciprocal(jnp.sum(p, axis=-1, keepdims=True), approx=True)
        outs.append(jnp.dot(p.astype(v.dtype), v,
                            preferred_element_type=jnp.float32))
    o = outs[0] if heads_per_block == 1 else jnp.concatenate(outs, axis=-1)
    o_ref[0] = o.astype(o_ref.dtype)       # single lane-dense store per step


def attention(q, k, v, mask_bias):
    """q/k/v: [B, H, S, dh] (bf16), mask_bias: [B, 1, S] (f32) -> [B, S, H*dh]."""
    B, H, S, dh = q.shape
    D = H * dh
    hpb = _heads_per_block(H, dh)
    kernel = functools.partial(_attention_kernel,
                               scale=1.0 / float(dh) ** 0.5,
                               heads_per_block=hpb)
    qkv_spec = pl.BlockSpec((1, hpb, S, dh), lambda b, g: (b, g, 0, 0))
    return pl.pallas_call(
        kernel,
        out_shape=jax.ShapeDtypeStruct((B, S, D), q.dtype),
        grid=(B, H // hpb),
        in_specs=[qkv_spec, qkv_spec, qkv_spec,
                  pl.BlockSpec((1, 1, S), lambda b, g: (b, 0, 0))],
        out_specs=pl.BlockSpec((1, S, hpb * dh), lambda b, g: (b, 0, g)),
        compiler_params=pltpu.CompilerParams(
            dimension_semantics=("parallel", "parallel"),
            vmem_limit_bytes=VMEM_LIMIT),
    )(q, k, v, mask_bias)


# ----------------------------------------------------------------------------
# Model glue (plain JAX: embedding gathers, head-major relayout, CLS head)
# ----------------------------------------------------------------------------
def bert_encoder_layer(x_flat, mask_bias, p, num_heads, B, S):
    M, D = x_flat.shape
    dh = D // num_heads
    qkv = linear(x_flat, p["wqkv"], p["bqkv"])                   # fused QKV [M, 3D]
    # head-major relayout (XLA): [B, S, 3, H, dh] -> [3, B, H, S, dh]
    qkv = jnp.moveaxis(qkv.reshape(B, S, 3, num_heads, dh), (2, 3), (0, 2))
    ctx = attention(qkv[0], qkv[1], qkv[2], mask_bias)           # [B, S, D]
    # attention output projection + residual + LayerNorm fused in one kernel
    x_flat = linear_add_ln(ctx.reshape(M, D), p["wo"], p["bo"],
                           x_flat, p["ln1_g"], p["ln1_b"])
    # FFN (GELU) + residual + LayerNorm fused; [M, d_ff] stays on-chip
    # TODO(synk): dropout is identity at inference; not modeled stochastically.
    x_flat = ffn_add_ln(x_flat, p["w1"], p["b1"], p["w2"], p["b2"],
                        p["ln2_g"], p["ln2_b"])
    return x_flat


def bert_for_sequence_classification(params, input_ids, token_type_ids=None,
                                     attention_mask=None, *, num_heads):
    B, S = input_ids.shape
    D = params["tok_emb"].shape[1]
    if token_type_ids is None:
        token_type_ids = jnp.zeros_like(input_ids)
    if attention_mask is None:
        attention_mask = jnp.ones((B, S), jnp.float32)

    # Embedding gathers stay in plain JAX (data-dependent gather).
    tok = jnp.take(params["tok_emb"], input_ids, axis=0)          # [B, S, D]
    pos = params["pos_emb"][None, :S, :]
    typ = jnp.take(params["type_emb"], token_type_ids, axis=0)
    emb = (tok + pos + typ).reshape(B * S, D)                     # f32
    x = layernorm(emb, params["emb_ln_g"], params["emb_ln_b"],
                  out_dtype=COMPUTE_DTYPE)                        # [M, D] bf16

    # additive attention-mask bias computed once, reused by every layer (f32)
    mask_bias = ((1.0 - attention_mask.astype(jnp.float32)) * -1e9
                 ).reshape(B, 1, S)

    for lp in params["layers"]:
        x = bert_encoder_layer(x, mask_bias, lp, num_heads, B, S)

    # Classification head on the CLS token: [B, D] matmuls with B ~ 2-8 and
    # num_classes = 2 -> plain JAX (pallas_calls here are pure launch overhead).
    cls = x.reshape(B, S, D)[:, 0, :].astype(jnp.float32)
    hid = jax.nn.relu(jnp.dot(cls, params["cls_w1"].astype(jnp.float32))
                      + params["cls_b1"])
    logits = (jnp.dot(hid, params["cls_w2"].astype(jnp.float32))
              + params["cls_b2"])                                 # [B, classes]
    return logits


# ----------------------------------------------------------------------------
# Deterministic parameter init (weights bf16 for MXU, biases/LN/embeddings f32)
# ----------------------------------------------------------------------------
def init_params(key, vocab_size, d_model, h, num_layers, d_ff, seq_len,
                num_classes, type_vocab=2):
    def dense(k, fan_in, fan_out):
        w = jax.random.normal(k, (fan_in, fan_out), jnp.float32) * 0.02
        return w.astype(COMPUTE_DTYPE), jnp.zeros((fan_out,), jnp.float32)

    keys = iter(jax.random.split(key, 8 + num_layers * 8))
    params = {
        "tok_emb": jax.random.normal(next(keys), (vocab_size, d_model)) * 0.02,
        "pos_emb": jax.random.normal(next(keys), (seq_len, d_model)) * 0.02,
        "type_emb": jax.random.normal(next(keys), (type_vocab, d_model)) * 0.02,
        "emb_ln_g": jnp.ones((d_model,), jnp.float32),
        "emb_ln_b": jnp.zeros((d_model,), jnp.float32),
        "layers": [],
    }
    for _ in range(num_layers):
        lp = {}
        lp["wqkv"], lp["bqkv"] = dense(next(keys), d_model, 3 * d_model)  # fused QKV
        lp["wo"], lp["bo"] = dense(next(keys), d_model, d_model)
        lp["w1"], lp["b1"] = dense(next(keys), d_model, d_ff)
        lp["w2"], lp["b2"] = dense(next(keys), d_ff, d_model)
        lp["ln1_g"] = jnp.ones((d_model,), jnp.float32)
        lp["ln1_b"] = jnp.zeros((d_model,), jnp.float32)
        lp["ln2_g"] = jnp.ones((d_model,), jnp.float32)
        lp["ln2_b"] = jnp.zeros((d_model,), jnp.float32)
        params["layers"].append(lp)

    params["cls_w1"], params["cls_b1"] = dense(next(keys), d_model, d_model // 2)
    params["cls_w2"], params["cls_b2"] = dense(next(keys), d_model // 2, num_classes)
    return params


# ----------------------------------------------------------------------------
if __name__ == "__main__":
    # Small shapes consistent with the module (scaled down from
    # d_model=512, h=8, num_layers=8, d_ff=2048, seq_len=64).
    vocab_size, d_model, h, num_layers = 32, 32, 4, 2
    d_ff, seq_len, num_classes, batch = 64, 8, 2, 2

    key = jax.random.PRNGKey(0)
    pkey, ikey = jax.random.split(key)
    params = init_params(pkey, vocab_size, d_model, h, num_layers, d_ff,
                         seq_len, num_classes)

    input_ids = jax.random.randint(ikey, (batch, seq_len), 0, vocab_size,
                                   dtype=jnp.int32)
    token_type_ids = jnp.zeros((batch, seq_len), jnp.int32)
    attention_mask = jnp.ones((batch, seq_len), jnp.float32)

    fwd = jax.jit(functools.partial(bert_for_sequence_classification,
                                    num_heads=h))
    logits = fwd(params, input_ids, token_type_ids, attention_mask)
    logits = jax.block_until_ready(logits)

    assert logits.shape == (batch, num_classes)
    assert bool(jnp.all(jnp.isfinite(logits)))
    print("KERNEL_OK")
</pallas_src>

<mosaic_0001>
module attributes {stable_mosaic.version = 11 : i64} {
  func.func @_ln_kernel(%arg0: i32, %arg1: memref<16x32xf32, #tpu.memory_space<vmem>>, %arg2: memref<1x32xf32, #tpu.memory_space<vmem>>, %arg3: memref<1x32xf32, #tpu.memory_space<vmem>>, %arg4: memref<16x32xbf16, #tpu.memory_space<vmem>>) attributes {dimension_semantics = [#tpu.dimension_semantics<parallel>], iteration_bounds = array<i64: 1>, scalar_prefetch = 0 : i64, scratch_operands = 0 : i64, tpu.core_type = #tpu.core_type<tc>, window_params = [{transform_indices = @transform_0, window_bounds = array<i64: 16, 32>}, {pipeline_mode = #tpu.pipeline_mode<synchronous>, transform_indices = @transform_1, window_bounds = array<i64: 1, 32>}, {pipeline_mode = #tpu.pipeline_mode<synchronous>, transform_indices = @transform_2, window_bounds = array<i64: 1, 32>}, {transform_indices = @transform_3, window_bounds = array<i64: 16, 32>}]} {
    %c0 = arith.constant 0 : index
    %c0_0 = arith.constant 0 : index
    %0 = vector.load %arg1[%c0, %c0_0] : memref<16x32xf32, #tpu.memory_space<vmem>>, vector<16x32xf32>
    %cst = arith.constant dense<0.000000e+00> : vector<16xf32>
    %1 = vector.multi_reduction <add>, %0, %cst [1] : vector<16x32xf32> to vector<16xf32>
    %2 = vector.shape_cast %1 : vector<16xf32> to vector<16x1xf32>
    %cst_1 = arith.constant 3.200000e+01 : f32
    %3 = vector.broadcast %cst_1 : f32 to vector<16x1xf32>
    %4 = arith.divf %2, %3 : vector<16x1xf32>
    %5 = vector.broadcast %4 : vector<16x1xf32> to vector<16x32xf32>
    %6 = arith.subf %0, %5 : vector<16x32xf32>
    %7 = arith.mulf %6, %6 : vector<16x32xf32>
    %cst_2 = arith.constant dense<0.000000e+00> : vector<16xf32>
    %8 = vector.multi_reduction <add>, %7, %cst_2 [1] : vector<16x32xf32> to vector<16xf32>
    %9 = vector.shape_cast %8 : vector<16xf32> to vector<16x1xf32>
    %cst_3 = arith.constant 3.200000e+01 : f32
    %10 = vector.broadcast %cst_3 : f32 to vector<16x1xf32>
    %11 = arith.divf %9, %10 : vector<16x1xf32>
    %12 = vector.broadcast %4 : vector<16x1xf32> to vector<16x32xf32>
    %13 = arith.subf %0, %12 : vector<16x32xf32>
    %cst_4 = arith.constant 9.99999996E-13 : f32
    %14 = vector.broadcast %cst_4 : f32 to vector<16x1xf32>
    %15 = arith.addf %11, %14 : vector<16x1xf32>
    %16 = math.rsqrt %15 : vector<16x1xf32>
    %17 = vector.broadcast %16 : vector<16x1xf32> to vector<16x32xf32>
    %18 = arith.mulf %13, %17 : vector<16x32xf32>
    %c0_5 = arith.constant 0 : index
    %c0_6 = arith.constant 0 : index
    %19 = vector.load %arg2[%c0_5, %c0_6] : memref<1x32xf32, #tpu.memory_space<vmem>>, vector<1x32xf32>
    %20 = vector.broadcast %19 : vector<1x32xf32> to vector<16x32xf32>
    %21 = arith.mulf %18, %20 : vector<16x32xf32>
    %c0_7 = arith.constant 0 : index
    %c0_8 = arith.constant 0 : index
    %22 = vector.load %arg3[%c0_7, %c0_8] : memref<1x32xf32, #tpu.memory_space<vmem>>, vector<1x32xf32>
    %23 = vector.broadcast %22 : vector<1x32xf32> to vector<16x32xf32>
    %24 = arith.addf %21, %23 : vector<16x32xf32>
    %25 = arith.truncf %24 : vector<16x32xf32> to vector<16x32xbf16>
    %c0_9 = arith.constant 0 : index
    %c0_10 = arith.constant 0 : index
    %26 = vector.load %arg4[%c0_9, %c0_10] : memref<16x32xbf16, #tpu.memory_space<vmem>>, vector<16x32xbf16>
    tpu.vector_store %arg4[%c0_9, %c0_10], %25 {strides = array<i32>} : memref<16x32xbf16, #tpu.memory_space<vmem>>, vector<16x32xbf16>,
    return
  }
  func.func @transform_0(%arg0: i32) -> (i32, i32) {
    %c0_i32 = arith.constant 0 : i32
    %c0_i32_0 = arith.constant 0 : i32
    return %arg0, %c0_i32 : i32, i32
  }
  func.func @transform_1(%arg0: i32) -> (i32, i32) {
    %c0_i32 = arith.constant 0 : i32
    %c0_i32_0 = arith.constant 0 : i32
    %c0_i32_1 = arith.constant 0 : i32
    return %c0_i32, %c0_i32_0 : i32, i32
  }
  func.func @transform_2(%arg0: i32) -> (i32, i32) {
    %c0_i32 = arith.constant 0 : i32
    %c0_i32_0 = arith.constant 0 : i32
    %c0_i32_1 = arith.constant 0 : i32
    return %c0_i32, %c0_i32_0 : i32, i32
  }
  func.func @transform_3(%arg0: i32) -> (i32, i32) {
    %c0_i32 = arith.constant 0 : i32
    %c0_i32_0 = arith.constant 0 : i32
    return %arg0, %c0_i32 : i32, i32
  }
}

module attributes {stable_mosaic.version = 11 : i64} {
  func.func @_linear_kernel(%arg0: i32, %arg1: i32, %arg2: i32, %arg3: memref<16x32xbf16, #tpu.memory_space<vmem>>, %arg4: memref<32x96xbf16, #tpu.memory_space<vmem>>, %arg5: memref<1x96xf32, #tpu.memory_space<vmem>>, %arg6: memref<16x96xbf16, #tpu.memory_space<vmem>>, %arg7: memref<16x96xf32, #tpu.memory_space<vmem>>) attributes {dimension_semantics = [#tpu.dimension_semantics<parallel>, #tpu.dimension_semantics<parallel>, #tpu.dimension_semantics<arbitrary>], iteration_bounds = array<i64: 1, 1, 1>, scalar_prefetch = 0 : i64, scratch_operands = 1 : i64, tpu.core_type = #tpu.core_type<tc>, window_params = [{transform_indices = @transform_0, window_bounds = array<i64: 16, 32>}, {transform_indices = @transform_1, window_bounds = array<i64: 32, 96>}, {transform_indices = @transform_2, window_bounds = array<i64: 1, 96>}, {transform_indices = @transform_3, window_bounds = array<i64: 16, 96>}]} {
    %c0_i32 = arith.constant 0 : i32
    %0 = arith.cmpi eq, %arg2, %c0_i32 : i32
    %1 = arith.extui %0 : i1 to i32
    %c0_i32_0 = arith.constant 0 : i32
    %2 = arith.cmpi ne, %1, %c0_i32_0 : i32
    scf.if %2 {
      %cst_10 = arith.constant 0.000000e+00 : f32
      %12 = vector.broadcast %cst_10 : f32 to vector<16x96xf32>
      %c0_11 = arith.constant 0 : index
      %c0_12 = arith.constant 0 : index
      %13 = vector.load %arg7[%c0_11, %c0_12] : memref<16x96xf32, #tpu.memory_space<vmem>>, vector<16x96xf32>
      tpu.vector_store %arg7[%c0_11, %c0_12], %12 {strides = array<i32>} : memref<16x96xf32, #tpu.memory_space<vmem>>, vector<16x96xf32>,
    } else {
    }
    %c0 = arith.constant 0 : index
    %c0_1 = arith.constant 0 : index
    %3 = vector.load %arg7[%c0, %c0_1] : memref<16x96xf32, #tpu.memory_space<vmem>>, vector<16x96xf32>
    %c0_2 = arith.constant 0 : index
    %c0_3 = arith.constant 0 : index
    %4 = vector.load %arg3[%c0_2, %c0_3] : memref<16x32xbf16, #tpu.memory_space<vmem>>, vector<16x32xbf16>
    %c0_4 = arith.constant 0 : index
    %c0_5 = arith.constant 0 : index
    %5 = vector.load %arg4[%c0_4, %c0_5] : memref<32x96xbf16, #tpu.memory_space<vmem>>, vector<32x96xbf16>
    %cst = arith.constant dense<0.000000e+00> : vector<16x96xf32>
    %6 = tpu.matmul %4, %5, %cst {dimension_numbers = #tpu.dot_dimension_numbers<[1], [0], [0], [1], [0, 0, 1, 1], [], []>} : vector<16x32xbf16>, vector<32x96xbf16>, vector<16x96xf32> -> vector<16x96xf32>
    %7 = arith.addf %3, %6 : vector<16x96xf32>
    %c0_6 = arith.constant 0 : index
    %c0_7 = arith.constant 0 : index
    %8 = vector.load %arg7[%c0_6, %c0_7] : memref<16x96xf32, #tpu.memory_space<vmem>>, vector<16x96xf32>
    tpu.vector_store %arg7[%c0_6, %c0_7], %7 {strides = array<i32>} : memref<16x96xf32, #tpu.memory_space<vmem>>, vector<16x96xf32>,
    %c0_i32_8 = arith.constant 0 : i32
    %9 = arith.cmpi eq, %arg2, %c0_i32_8 : i32
    %10 = arith.extui %9 : i1 to i32
    %c0_i32_9 = arith.constant 0 : i32
    %11 = arith.cmpi ne, %10, %c0_i32_9 : i32
    scf.if %11 {
      %c0_10 = arith.constant 0 : index
      %c0_11 = arith.constant 0 : index
      %12 = vector.load %arg7[%c0_10, %c0_11] : memref<16x96xf32, #tpu.memory_space<vmem>>, vector<16x96xf32>
      %c0_12 = arith.constant 0 : index
      %c0_13 = arith.constant 0 : index
      %13 = vector.load %arg5[%c0_12, %c0_13] : memref<1x96xf32, #tpu.memory_space<vmem>>, vector<1x96xf32>
      %14 = vector.broadcast %13 : vector<1x96xf32> to vector<16x96xf32>
      %15 = arith.addf %12, %14 : vector<16x96xf32>
      %16 = arith.truncf %15 : vector<16x96xf32> to vector<16x96xbf16>
      %c0_14 = arith.constant 0 : index
      %c0_15 = arith.constant 0 : index
      %17 = vector.load %arg6[%c0_14, %c0_15] : memref<16x96xbf16, #tpu.memory_space<vmem>>, vector<16x96xbf16>
      tpu.vector_store %arg6[%c0_14, %c0_15], %16 {strides = array<i32>} : memref<16x96xbf16, #tpu.memory_space<vmem>>, vector<16x96xbf16>,
    } else {
    }
    return
  }
  func.func @transform_0(%arg0: i32, %arg1: i32, %arg2: i32) -> (i32, i32) {
    %c0_i32 = arith.constant 0 : i32
    return %arg0, %arg2 : i32, i32
  }
  func.func @transform_1(%arg0: i32, %arg1: i32, %arg2: i32) -> (i32, i32) {
    %c0_i32 = arith.constant 0 : i32
    return %arg2, %arg1 : i32, i32
  }
  func.func @transform_2(%arg0: i32, %arg1: i32, %arg2: i32) -> (i32, i32) {
    %c0_i32 = arith.constant 0 : i32
    %c0_i32_0 = arith.constant 0 : i32
    return %c0_i32, %arg1 : i32, i32
  }
  func.func @transform_3(%arg0: i32, %arg1: i32, %arg2: i32) -> (i32, i32) {
    %c0_i32 = arith.constant 0 : i32
    return %arg0, %arg1 : i32, i32
  }
}

module attributes {stable_mosaic.version = 11 : i64} {
  func.func @_attention_kernel(%arg0: i32, %arg1: i32, %arg2: memref<1x4x8x8xbf16, #tpu.memory_space<vmem>>, %arg3: memref<1x4x8x8xbf16, #tpu.memory_space<vmem>>, %arg4: memref<1x4x8x8xbf16, #tpu.memory_space<vmem>>, %arg5: memref<1x1x8xf32, #tpu.memory_space<vmem>>, %arg6: memref<1x8x32xbf16, #tpu.memory_space<vmem>>) attributes {dimension_semantics = [#tpu.dimension_semantics<parallel>, #tpu.dimension_semantics<parallel>], iteration_bounds = array<i64: 2, 1>, scalar_prefetch = 0 : i64, scratch_operands = 0 : i64, tpu.core_type = #tpu.core_type<tc>, window_params = [{transform_indices = @transform_0, window_bounds = array<i64: 1, 4, 8, 8>}, {transform_indices = @transform_1, window_bounds = array<i64: 1, 4, 8, 8>}, {transform_indices = @transform_2, window_bounds = array<i64: 1, 4, 8, 8>}, {transform_indices = @transform_3, window_bounds = array<i64: 1, 1, 8>}, {transform_indices = @transform_4, window_bounds = array<i64: 1, 8, 32>}]} {
    %c0 = arith.constant 0 : index
    %c0_0 = arith.constant 0 : index
    %c0_1 = arith.constant 0 : index
    %0 = vector.load %arg5[%c0, %c0_0, %c0_1] : memref<1x1x8xf32, #tpu.memory_space<vmem>>, vector<1x1x8xf32>
    %1 = vector.shape_cast %0 : vector<1x1x8xf32> to vector<1x8xf32>
    %2 = vector.shape_cast %1 : vector<1x8xf32> to vector<1x8xf32>
    %3 = vector.broadcast %2 : vector<1x8xf32> to vector<8x8xf32>
    %c0_2 = arith.constant 0 : index
    %c0_3 = arith.constant 0 : index
    %c0_4 = arith.constant 0 : index
    %c0_5 = arith.constant 0 : index
    %4 = vector.load %arg2[%c0_2, %c0_3, %c0_4, %c0_5] : memref<1x4x8x8xbf16, #tpu.memory_space<vmem>>, vector<1x1x8x8xbf16>
    %5 = vector.shape_cast %4 : vector<1x1x8x8xbf16> to vector<8x8xbf16>
    %c0_6 = arith.constant 0 : index
    %c0_7 = arith.constant 0 : index
    %c0_8 = arith.constant 0 : index
    %c0_9 = arith.constant 0 : index
    %6 = vector.load %arg3[%c0_6, %c0_7, %c0_8, %c0_9] : memref<1x4x8x8xbf16, #tpu.memory_space<vmem>>, vector<1x1x8x8xbf16>
    %7 = vector.shape_cast %6 : vector<1x1x8x8xbf16> to vector<8x8xbf16>
    %c0_10 = arith.constant 0 : index
    %c0_11 = arith.constant 0 : index
    %c0_12 = arith.constant 0 : index
    %c0_13 = arith.constant 0 : index
    %8 = vector.load %arg4[%c0_10, %c0_11, %c0_12, %c0_13] : memref<1x4x8x8xbf16, #tpu.memory_space<vmem>>, vector<1x1x8x8xbf16>
    %9 = vector.shape_cast %8 : vector<1x1x8x8xbf16> to vector<8x8xbf16>
    %cst = arith.constant dense<0.000000e+00> : vector<8x8xf32>
    %10 = tpu.matmul %5, %7, %cst {dimension_numbers = #tpu.dot_dimension_numbers<[1], [1], [0], [0], [0, 0, 1, 0], [], []>} : vector<8x8xbf16>, vector<8x8xbf16>, vector<8x8xf32> -> vector<8x8xf32>
    %cst_14 = arith.constant 0.353553385 : f32
    %11 = vector.broadcast %cst_14 : f32 to vector<8x8xf32>
    %12 = arith.mulf %10, %11 : vector<8x8xf32>
    %13 = arith.addf %12, %3 : vector<8x8xf32>
    %cst_15 = arith.constant dense<0xFF800000> : vector<8xf32>
    %14 = vector.multi_reduction <maximumf>, %13, %cst_15 [1] : vector<8x8xf32> to vector<8xf32>
    %15 = vector.shape_cast %14 : vector<8xf32> to vector<8x1xf32>
    %16 = vector.broadcast %15 : vector<8x1xf32> to vector<8x8xf32>
    %17 = arith.subf %13, %16 : vector<8x8xf32>
    %18 = math.exp %17 : vector<8x8xf32>
    %cst_16 = arith.constant dense<0.000000e+00> : vector<8xf32>
    %19 = vector.multi_reduction <add>, %18, %cst_16 [1] : vector<8x8xf32> to vector<8xf32>
    %20 = vector.shape_cast %19 : vector<8xf32> to vector<8x1xf32>
    %21 = tpu.reciprocal %20 {approx = true} : vector<8x1xf32> -> vector<8x1xf32>
    %22 = vector.broadcast %21 : vector<8x1xf32> to vector<8x8xf32>
    %23 = arith.mulf %18, %22 : vector<8x8xf32>
    %24 = arith.truncf %23 : vector<8x8xf32> to vector<8x8xbf16>
    %cst_17 = arith.constant dense<0.000000e+00> : vector<8x8xf32>
    %25 = tpu.matmul %24, %9, %cst_17 {dimension_numbers = #tpu.dot_dimension_numbers<[1], [0], [0], [1], [0, 0, 1, 1], [], []>} : vector<8x8xbf16>, vector<8x8xbf16>, vector<8x8xf32> -> vector<8x8xf32>
    %c0_18 = arith.constant 0 : index
    %c1 = arith.constant 1 : index
    %c0_19 = arith.constant 0 : index
    %c0_20 = arith.constant 0 : index
    %26 = vector.load %arg2[%c0_18, %c1, %c0_19, %c0_20] : memref<1x4x8x8xbf16, #tpu.memory_space<vmem>>, vector<1x1x8x8xbf16>
    %27 = vector.shape_cast %26 : vector<1x1x8x8xbf16> to vector<8x8xbf16>
    %c0_21 = arith.constant 0 : index
    %c1_22 = arith.constant 1 : index
    %c0_23 = arith.constant 0 : index
    %c0_24 = arith.constant 0 : index
    %28 = vector.load %arg3[%c0_21, %c1_22, %c0_23, %c0_24] : memref<1x4x8x8xbf16, #tpu.memory_space<vmem>>, vector<1x1x8x8xbf16>
    %29 = vector.shape_cast %28 : vector<1x1x8x8xbf16> to vector<8x8xbf16>
    %c0_25 = arith.constant 0 : index
    %c1_26 = arith.constant 1 : index
    %c0_27 = arith.constant 0 : index
    %c0_28 = arith.constant 0 : index
    %30 = vector.load %arg4[%c0_25, %c1_26, %c0_27, %c0_28] : memref<1x4x8x8xbf16, #tpu.memory_space<vmem>>, vector<1x1x8x8xbf16>
    %31 = vector.shape_cast %30 : vector<1x1x8x8xbf16> to vector<8x8xbf16>
    %cst_29 = arith.constant dense<0.000000e+00> : vector<8x8xf32>
    %32 = tpu.matmul %27, %29, %cst_29 {dimension_numbers = #tpu.dot_dimension_numbers<[1], [1], [0], [0], [0, 0, 1, 0], [], []>} : vector<8x8xbf16>, vector<8x8xbf16>, vector<8x8xf32> -> vector<8x8xf32>
    %cst_30 = arith.constant 0.353553385 : f32
    %33 = vector.broadcast %cst_30 : f32 to vector<8x8xf32>
    %34 = arith.mulf %32, %33 : vector<8x8xf32>
    %35 = arith.addf %34, %3 : vector<8x8xf32>
    %cst_31 = arith.constant dense<0xFF800000> : vector<8xf32>
    %36 = vector.multi_reduction <maximumf>, %35, %cst_31 [1] : vector<8x8xf32> to vector<8xf32>
    %37 = vector.shape_cast %36 : vector<8xf32> to vector<8x1xf32>
    %38 = vector.broadcast %37 : vector<8x1xf32> to vector<8x8xf32>
    %39 = arith.subf %35, %38 : vector<8x8xf32>
    %40 = math.exp %39 : vector<8x8xf32>
    %cst_32 = arith.constant dense<0.000000e+00> : vector<8xf32>
    %41 = vector.multi_reduction <add>, %40, %cst_32 [1] : vector<8x8xf32> to vector<8xf32>
    %42 = vector.shape_cast %41 : vector<8xf32> to vector<8x1xf32>
    %43 = tpu.reciprocal %42 {approx = true} : vector<8x1xf32> -> vector<8x1xf32>
    %44 = vector.broadcast %43 : vector<8x1xf32> to vector<8x8xf32>
    %45 = arith.mulf %40, %44 : vector<8x8xf32>
    %46 = arith.truncf %45 : vector<8x8xf32> to vector<8x8xbf16>
    %cst_33 = arith.constant dense<0.000000e+00> : vector<8x8xf32>
    %47 = tpu.matmul %46, %31, %cst_33 {dimension_numbers = #tpu.dot_dimension_numbers<[1], [0], [0], [1], [0, 0, 1, 1], [], []>} : vector<8x8xbf16>, vector<8x8xbf16>, vector<8x8xf32> -> vector<8x8xf32>
    %c0_34 = arith.constant 0 : index
    %c2 = arith.constant 2 : index
    %c0_35 = arith.constant 0 : index
    %c0_36 = arith.constant 0 : index
    %48 = vector.load %arg2[%c0_34, %c2, %c0_35, %c0_36] : memref<1x4x8x8xbf16, #tpu.memory_space<vmem>>, vector<1x1x8x8xbf16>
    %49 = vector.shape_cast %48 : vector<1x1x8x8xbf16> to vector<8x8xbf16>
    %c0_37 = arith.constant 0 : index
    %c2_38 = arith.constant 2 : index
    %c0_39 = arith.constant 0 : index
    %c0_40 = arith.constant 0 : index
    %50 = vector.load %arg3[%c0_37, %c2_38, %c0_39, %c0_40] : memref<1x4x8x8xbf16, #tpu.memory_space<vmem>>, vector<1x1x8x8xbf16>
    %51 = vector.shape_cast %50 : vector<1x1x8x8xbf16> to vector<8x8xbf16>
    %c0_41 = arith.constant 0 : index
    %c2_42 = arith.constant 2 : index
    %c0_43 = arith.constant 0 : index
    %c0_44 = arith.constant 0 : index
    %52 = vector.load %arg4[%c0_41, %c2_42, %c0_43, %c0_44] : memref<1x4x8x8xbf16, #tpu.memory_space<vmem>>, vector<1x1x8x8xbf16>
    %53 = vector.shape_cast %52 : vector<1x1x8x8xbf16> to vector<8x8xbf16>
    %cst_45 = arith.constant dense<0.000000e+00> : vector<8x8xf32>
    %54 = tpu.matmul %49, %51, %cst_45 {dimension_numbers = #tpu.dot_dimension_numbers<[1], [1], [0], [0], [0, 0, 1, 0], [], []>} : vector<8x8xbf16>, vector<8x8xbf16>, vector<8x8xf32> -> vector<8x8xf32>
    %cst_46 = arith.constant 0.353553385 : f32
    %55 = vector.broadcast %cst_46 : f32 to vector<8x8xf32>
    %56 = arith.mulf %54, %55 : vector<8x8xf32>
    %57 = arith.addf %56, %3 : vector<8x8xf32>
    %cst_47 = arith.constant dense<0xFF800000> : vector<8xf32>
    %58 = vector.multi_reduction <maximumf>, %57, %cst_47 [1] : vector<8x8xf32> to vector<8xf32>
    %59 = vector.shape_cast %58 : vector<8xf32> to vector<8x1xf32>
    %60 = vector.broadcast %59 : vector<8x1xf32> to vector<8x8xf32>
    %61 = arith.subf %57, %60 : vector<8x8xf32>
    %62 = math.exp %61 : vector<8x8xf32>
    %cst_48 = arith.constant dense<0.000000e+00> : vector<8xf32>
    %63 = vector.multi_reduction <add>, %62, %cst_48 [1] : vector<8x8xf32> to vector<8xf32>
    %64 = vector.shape_cast %63 : vector<8xf32> to vector<8x1xf32>
    %65 = tpu.reciprocal %64 {approx = true} : vector<8x1xf32> -> vector<8x1xf32>
    %66 = vector.broadcast %65 : vector<8x1xf32> to vector<8x8xf32>
    %67 = arith.mulf %62, %66 : vector<8x8xf32>
    %68 = arith.truncf %67 : vector<8x8xf32> to vector<8x8xbf16>
    %cst_49 = arith.constant dense<0.000000e+00> : vector<8x8xf32>
    %69 = tpu.matmul %68, %53, %cst_49 {dimension_numbers = #tpu.dot_dimension_numbers<[1], [0], [0], [1], [0, 0, 1, 1], [], []>} : vector<8x8xbf16>, vector<8x8xbf16>, vector<8x8xf32> -> vector<8x8xf32>
    %c0_50 = arith.constant 0 : index
    %c3 = arith.constant 3 : index
    %c0_51 = arith.constant 0 : index
    %c0_52 = arith.constant 0 : index
    %70 = vector.load %arg2[%c0_50, %c3, %c0_51, %c0_52] : memref<1x4x8x8xbf16, #tpu.memory_space<vmem>>, vector<1x1x8x8xbf16>
    %71 = vector.shape_cast %70 : vector<1x1x8x8xbf16> to vector<8x8xbf16>
    %c0_53 = arith.constant 0 : index
    %c3_54 = arith.constant 3 : index
    %c0_55 = arith.constant 0 : index
    %c0_56 = arith.constant 0 : index
    %72 = vector.load %arg3[%c0_53, %c3_54, %c0_55, %c0_56] : memref<1x4x8x8xbf16, #tpu.memory_space<vmem>>, vector<1x1x8x8xbf16>
    %73 = vector.shape_cast %72 : vector<1x1x8x8xbf16> to vector<8x8xbf16>
    %c0_57 = arith.constant 0 : index
    %c3_58 = arith.constant 3 : index
    %c0_59 = arith.constant 0 : index
    %c0_60 = arith.constant 0 : index
    %74 = vector.load %arg4[%c0_57, %c3_58, %c0_59, %c0_60] : memref<1x4x8x8xbf16, #tpu.memory_space<vmem>>, vector<1x1x8x8xbf16>
    %75 = vector.shape_cast %74 : vector<1x1x8x8xbf16> to vector<8x8xbf16>
    %cst_61 = arith.constant dense<0.000000e+00> : vector<8x8xf32>
    %76 = tpu.matmul %71, %73, %cst_61 {dimension_numbers = #tpu.dot_dimension_numbers<[1], [1], [0], [0], [0, 0, 1, 0], [], []>} : vector<8x8xbf16>, vector<8x8xbf16>, vector<8x8xf32> -> vector<8x8xf32>
    %cst_62 = arith.constant 0.353553385 : f32
    %77 = vector.broadcast %cst_62 : f32 to vector<8x8xf32>
    %78 = arith.mulf %76, %77 : vector<8x8xf32>
    %79 = arith.addf %78, %3 : vector<8x8xf32>
    %cst_63 = arith.constant dense<0xFF800000> : vector<8xf32>
    %80 = vector.multi_reduction <maximumf>, %79, %cst_63 [1] : vector<8x8xf32> to vector<8xf32>
    %81 = vector.shape_cast %80 : vector<8xf32> to vector<8x1xf32>
    %82 = vector.broadcast %81 : vector<8x1xf32> to vector<8x8xf32>
    %83 = arith.subf %79, %82 : vector<8x8xf32>
    %84 = math.exp %83 : vector<8x8xf32>
    %cst_64 = arith.constant dense<0.000000e+00> : vector<8xf32>
    %85 = vector.multi_reduction <add>, %84, %cst_64 [1] : vector<8x8xf32> to vector<8xf32>
    %86 = vector.shape_cast %85 : vector<8xf32> to vector<8x1xf32>
    %87 = tpu.reciprocal %86 {approx = true} : vector<8x1xf32> -> vector<8x1xf32>
    %88 = vector.broadcast %87 : vector<8x1xf32> to vector<8x8xf32>
    %89 = arith.mulf %84, %88 : vector<8x8xf32>
    %90 = arith.truncf %89 : vector<8x8xf32> to vector<8x8xbf16>
    %cst_65 = arith.constant dense<0.000000e+00> : vector<8x8xf32>
    %91 = tpu.matmul %90, %75, %cst_65 {dimension_numbers = #tpu.dot_dimension_numbers<[1], [0], [0], [1], [0, 0, 1, 1], [], []>} : vector<8x8xbf16>, vector<8x8xbf16>, vector<8x8xf32> -> vector<8x8xf32>
    %92 = tpu.concatenate %25, %47, %69, %91 in 1 : vector<8x8xf32>, vector<8x8xf32>, vector<8x8xf32>, vector<8x8xf32> -> vector<8x32xf32>
    %93 = arith.truncf %92 : vector<8x32xf32> to vector<8x32xbf16>
    %c0_66 = arith.constant 0 : index
    %c0_67 = arith.constant 0 : index
    %c0_68 = arith.constant 0 : index
    %94 = vector.load %arg6[%c0_66, %c0_67, %c0_68] : memref<1x8x32xbf16, #tpu.memory_space<vmem>>, vector<1x8x32xbf16>
    %95 = vector.shape_cast %94 : vector<1x8x32xbf16> to vector<8x32xbf16>
    %96 = vector.shape_cast %93 : vector<8x32xbf16> to vector<1x8x32xbf16>
    tpu.vector_store %arg6[%c0_66, %c0_67, %c0_68], %96 {strides = array<i32>} : memref<1x8x32xbf16, #tpu.memory_space<vmem>>, vector<1x8x32xbf16>,
    return
  }
  func.func @transform_0(%arg0: i32, %arg1: i32) -> (i32, i32, i32, i32) {
    %c0_i32 = arith.constant 0 : i32
    %c0_i32_0 = arith.constant 0 : i32
    %c0_i32_1 = arith.constant 0 : i32
    return %arg0, %arg1, %c0_i32, %c0_i32_0 : i32, i32, i32, i32
  }
  func.func @transform_1(%arg0: i32, %arg1: i32) -> (i32, i32, i32, i32) {
    %c0_i32 = arith.constant 0 : i32
    %c0_i32_0 = arith.constant 0 : i32
    %c0_i32_1 = arith.constant 0 : i32
    return %arg0, %arg1, %c0_i32, %c0_i32_0 : i32, i32, i32, i32
  }
  func.func @transform_2(%arg0: i32, %arg1: i32) -> (i32, i32, i32, i32) {
    %c0_i32 = arith.constant 0 : i32
    %c0_i32_0 = arith.constant 0 : i32
    %c0_i32_1 = arith.constant 0 : i32
    return %arg0, %arg1, %c0_i32, %c0_i32_0 : i32, i32, i32, i32
  }
  func.func @transform_3(%arg0: i32, %arg1: i32) -> (i32, i32, i32) {
    %c0_i32 = arith.constant 0 : i32
    %c0_i32_0 = arith.constant 0 : i32
    %c0_i32_1 = arith.constant 0 : i32
    return %arg0, %c0_i32, %c0_i32_0 : i32, i32, i32
  }
  func.func @transform_4(%arg0: i32, %arg1: i32) -> (i32, i32, i32) {
    %c0_i32 = arith.constant 0 : i32
    %c0_i32_0 = arith.constant 0 : i32
    return %arg0, %c0_i32, %arg1 : i32, i32, i32
  }
}

module attributes {stable_mosaic.version = 11 : i64} {
  func.func @_linear_add_ln_kernel(%arg0: i32, %arg1: i32, %arg2: memref<16x32xbf16, #tpu.memory_space<vmem>>, %arg3: memref<32x32xbf16, #tpu.memory_space<vmem>>, %arg4: memref<1x32xf32, #tpu.memory_space<vmem>>, %arg5: memref<16x32xbf16, #tpu.memory_space<vmem>>, %arg6: memref<1x32xf32, #tpu.memory_space<vmem>>, %arg7: memref<1x32xf32, #tpu.memory_space<vmem>>, %arg8: memref<16x32xbf16, #tpu.memory_space<vmem>>, %arg9: memref<16x32xf32, #tpu.memory_space<vmem>>) attributes {dimension_semantics = [#tpu.dimension_semantics<parallel>, #tpu.dimension_semantics<arbitrary>], iteration_bounds = array<i64: 1, 1>, scalar_prefetch = 0 : i64, scratch_operands = 1 : i64, tpu.core_type = #tpu.core_type<tc>, window_params = [{transform_indices = @transform_0, window_bounds = array<i64: 16, 32>}, {transform_indices = @transform_1, window_bounds = array<i64: 32, 32>}, {pipeline_mode = #tpu.pipeline_mode<synchronous>, transform_indices = @transform_2, window_bounds = array<i64: 1, 32>}, {transform_indices = @transform_3, window_bounds = array<i64: 16, 32>}, {pipeline_mode = #tpu.pipeline_mode<synchronous>, transform_indices = @transform_4, window_bounds = array<i64: 1, 32>}, {pipeline_mode = #tpu.pipeline_mode<synchronous>, transform_indices = @transform_5, window_bounds = array<i64: 1, 32>}, {transform_indices = @transform_6, window_bounds = array<i64: 16, 32>}]} {
    %c0_i32 = arith.constant 0 : i32
    %0 = arith.cmpi eq, %arg1, %c0_i32 : i32
    %1 = arith.extui %0 : i1 to i32
    %c0_i32_0 = arith.constant 0 : i32
    %2 = arith.cmpi ne, %1, %c0_i32_0 : i32
    scf.if %2 {
      %cst_10 = arith.constant 0.000000e+00 : f32
      %12 = vector.broadcast %cst_10 : f32 to vector<16x32xf32>
      %c0_11 = arith.constant 0 : index
      %c0_12 = arith.constant 0 : index
      %13 = vector.load %arg9[%c0_11, %c0_12] : memref<16x32xf32, #tpu.memory_space<vmem>>, vector<16x32xf32>
      tpu.vector_store %arg9[%c0_11, %c0_12], %12 {strides = array<i32>} : memref<16x32xf32, #tpu.memory_space<vmem>>, vector<16x32xf32>,
    } else {
    }
    %c0 = arith.constant 0 : index
    %c0_1 = arith.constant 0 : index
    %3 = vector.load %arg9[%c0, %c0_1] : memref<16x32xf32, #tpu.memory_space<vmem>>, vector<16x32xf32>
    %c0_2 = arith.constant 0 : index
    %c0_3 = arith.constant 0 : index
    %4 = vector.load %arg2[%c0_2, %c0_3] : memref<16x32xbf16, #tpu.memory_space<vmem>>, vector<16x32xbf16>
    %c0_4 = arith.constant 0 : index
    %c0_5 = arith.constant 0 : index
    %5 = vector.load %arg3[%c0_4, %c0_5] : memref<32x32xbf16, #tpu.memory_space<vmem>>, vector<32x32xbf16>
    %cst = arith.constant dense<0.000000e+00> : vector<16x32xf32>
    %6 = tpu.matmul %4, %5, %cst {dimension_numbers = #tpu.dot_dimension_numbers<[1], [0], [0], [1], [0, 0, 1, 1], [], []>} : vector<16x32xbf16>, vector<32x32xbf16>, vector<16x32xf32> -> vector<16x32xf32>
    %7 = arith.addf %3, %6 : vector<16x32xf32>
    %c0_6 = arith.constant 0 : index
    %c0_7 = arith.constant 0 : index
    %8 = vector.load %arg9[%c0_6, %c0_7] : memref<16x32xf32, #tpu.memory_space<vmem>>, vector<16x32xf32>
    tpu.vector_store %arg9[%c0_6, %c0_7], %7 {strides = array<i32>} : memref<16x32xf32, #tpu.memory_space<vmem>>, vector<16x32xf32>,
    %c0_i32_8 = arith.constant 0 : i32
    %9 = arith.cmpi eq, %arg1, %c0_i32_8 : i32
    %10 = arith.extui %9 : i1 to i32
    %c0_i32_9 = arith.constant 0 : i32
    %11 = arith.cmpi ne, %10, %c0_i32_9 : i32
    scf.if %11 {
      %c0_10 = arith.constant 0 : index
      %c0_11 = arith.constant 0 : index
      %12 = vector.load %arg9[%c0_10, %c0_11] : memref<16x32xf32, #tpu.memory_space<vmem>>, vector<16x32xf32>
      %c0_12 = arith.constant 0 : index
      %c0_13 = arith.constant 0 : index
      %13 = vector.load %arg4[%c0_12, %c0_13] : memref<1x32xf32, #tpu.memory_space<vmem>>, vector<1x32xf32>
      %14 = vector.broadcast %13 : vector<1x32xf32> to vector<16x32xf32>
      %15 = arith.addf %12, %14 : vector<16x32xf32>
      %c0_14 = arith.constant 0 : index
      %c0_15 = arith.constant 0 : index
      %16 = vector.load %arg5[%c0_14, %c0_15] : memref<16x32xbf16, #tpu.memory_space<vmem>>, vector<16x32xbf16>
      %17 = arith.extf %16 : vector<16x32xbf16> to vector<16x32xf32>
      %18 = arith.addf %15, %17 : vector<16x32xf32>
      %cst_16 = arith.constant dense<0.000000e+00> : vector<16xf32>
      %19 = vector.multi_reduction <add>, %18, %cst_16 [1] : vector<16x32xf32> to vector<16xf32>
      %20 = vector.shape_cast %19 : vector<16xf32> to vector<16x1xf32>
      %cst_17 = arith.constant 3.200000e+01 : f32
      %21 = vector.broadcast %cst_17 : f32 to vector<16x1xf32>
      %22 = arith.divf %20, %21 : vector<16x1xf32>
      %23 = vector.broadcast %22 : vector<16x1xf32> to vector<16x32xf32>
      %24 = arith.subf %18, %23 : vector<16x32xf32>
      %25 = arith.mulf %24, %24 : vector<16x32xf32>
      %cst_18 = arith.constant dense<0.000000e+00> : vector<16xf32>
      %26 = vector.multi_reduction <add>, %25, %cst_18 [1] : vector<16x32xf32> to vector<16xf32>
      %27 = vector.shape_cast %26 : vector<16xf32> to vector<16x1xf32>
      %cst_19 = arith.constant 3.200000e+01 : f32
      %28 = vector.broadcast %cst_19 : f32 to vector<16x1xf32>
      %29 = arith.divf %27, %28 : vector<16x1xf32>
      %30 = vector.broadcast %22 : vector<16x1xf32> to vector<16x32xf32>
      %31 = arith.subf %18, %30 : vector<16x32xf32>
      %cst_20 = arith.constant 9.99999996E-13 : f32
      %32 = vector.broadcast %cst_20 : f32 to vector<16x1xf32>
      %33 = arith.addf %29, %32 : vector<16x1xf32>
      %34 = math.rsqrt %33 : vector<16x1xf32>
      %35 = vector.broadcast %34 : vector<16x1xf32> to vector<16x32xf32>
      %36 = arith.mulf %31, %35 : vector<16x32xf32>
      %c0_21 = arith.constant 0 : index
      %c0_22 = arith.constant 0 : index
      %37 = vector.load %arg6[%c0_21, %c0_22] : memref<1x32xf32, #tpu.memory_space<vmem>>, vector<1x32xf32>
      %38 = vector.broadcast %37 : vector<1x32xf32> to vector<16x32xf32>
      %39 = arith.mulf %36, %38 : vector<16x32xf32>
      %c0_23 = arith.constant 0 : index
      %c0_24 = arith.constant 0 : index
      %40 = vector.load %arg7[%c0_23, %c0_24] : memref<1x32xf32, #tpu.memory_space<vmem>>, vector<1x32xf32>
      %41 = vector.broadcast %40 : vector<1x32xf32> to vector<16x32xf32>
      %42 = arith.addf %39, %41 : vector<16x32xf32>
      %43 = arith.truncf %42 : vector<16x32xf32> to vector<16x32xbf16>
      %c0_25 = arith.constant 0 : index
      %c0_26 = arith.constant 0 : index
      %44 = vector.load %arg8[%c0_25, %c0_26] : memref<16x32xbf16, #tpu.memory_space<vmem>>, vector<16x32xbf16>
      tpu.vector_store %arg8[%c0_25, %c0_26], %43 {strides = array<i32>} : memref<16x32xbf16, #tpu.memory_space<vmem>>, vector<16x32xbf16>,
    } else {
    }
    return
  }
  func.func @transform_0(%arg0: i32, %arg1: i32) -> (i32, i32) {
    %c0_i32 = arith.constant 0 : i32
    return %arg0, %arg1 : i32, i32
  }
  func.func @transform_1(%arg0: i32, %arg1: i32) -> (i32, i32) {
    %c0_i32 = arith.constant 0 : i32
    %c0_i32_0 = arith.constant 0 : i32
    return %arg1, %c0_i32 : i32, i32
  }
  func.func @transform_2(%arg0: i32, %arg1: i32) -> (i32, i32) {
    %c0_i32 = arith.constant 0 : i32
    %c0_i32_0 = arith.constant 0 : i32
    %c0_i32_1 = arith.constant 0 : i32
    return %c0_i32, %c0_i32_0 : i32, i32
  }
  func.func @transform_3(%arg0: i32, %arg1: i32) -> (i32, i32) {
    %c0_i32 = arith.constant 0 : i32
    %c0_i32_0 = arith.constant 0 : i32
    return %arg0, %c0_i32 : i32, i32
  }
  func.func @transform_4(%arg0: i32, %arg1: i32) -> (i32, i32) {
    %c0_i32 = arith.constant 0 : i32
    %c0_i32_0 = arith.constant 0 : i32
    %c0_i32_1 = arith.constant 0 : i32
    return %c0_i32, %c0_i32_0 : i32, i32
  }
  func.func @transform_5(%arg0: i32, %arg1: i32) -> (i32, i32) {
    %c0_i32 = arith.constant 0 : i32
    %c0_i32_0 = arith.constant 0 : i32
    %c0_i32_1 = arith.constant 0 : i32
    return %c0_i32, %c0_i32_0 : i32, i32
  }
  func.func @transform_6(%arg0: i32, %arg1: i32) -> (i32, i32) {
    %c0_i32 = arith.constant 0 : i32
    %c0_i32_0 = arith.constant 0 : i32
    return %arg0, %c0_i32 : i32, i32
  }
}

module attributes {stable_mosaic.version = 11 : i64} {
  func.func @_ffn_add_ln_kernel(%arg0: i32, %arg1: i32, %arg2: memref<16x32xbf16, #tpu.memory_space<vmem>>, %arg3: memref<32x64xbf16, #tpu.memory_space<vmem>>, %arg4: memref<1x64xf32, #tpu.memory_space<vmem>>, %arg5: memref<64x32xbf16, #tpu.memory_space<vmem>>, %arg6: memref<1x32xf32, #tpu.memory_space<vmem>>, %arg7: memref<1x32xf32, #tpu.memory_space<vmem>>, %arg8: memref<1x32xf32, #tpu.memory_space<vmem>>, %arg9: memref<16x32xbf16, #tpu.memory_space<vmem>>, %arg10: memref<16x32xf32, #tpu.memory_space<vmem>>) attributes {dimension_semantics = [#tpu.dimension_semantics<parallel>, #tpu.dimension_semantics<arbitrary>], iteration_bounds = array<i64: 1, 1>, scalar_prefetch = 0 : i64, scratch_operands = 1 : i64, tpu.core_type = #tpu.core_type<tc>, window_params = [{transform_indices = @transform_0, window_bounds = array<i64: 16, 32>}, {transform_indices = @transform_1, window_bounds = array<i64: 32, 64>}, {transform_indices = @transform_2, window_bounds = array<i64: 1, 64>}, {transform_indices = @transform_3, window_bounds = array<i64: 64, 32>}, {pipeline_mode = #tpu.pipeline_mode<synchronous>, transform_indices = @transform_4, window_bounds = array<i64: 1, 32>}, {pipeline_mode = #tpu.pipeline_mode<synchronous>, transform_indices = @transform_5, window_bounds = array<i64: 1, 32>}, {pipeline_mode = #tpu.pipeline_mode<synchronous>, transform_indices = @transform_6, window_bounds = array<i64: 1, 32>}, {transform_indices = @transform_7, window_bounds = array<i64: 16, 32>}]} {
    %c0_i32 = arith.constant 0 : i32
    %0 = arith.cmpi eq, %arg1, %c0_i32 : i32
    %1 = arith.extui %0 : i1 to i32
    %c0_i32_0 = arith.constant 0 : i32
    %2 = arith.cmpi ne, %1, %c0_i32_0 : i32
    scf.if %2 {
      %cst_19 = arith.constant 0.000000e+00 : f32
      %31 = vector.broadcast %cst_19 : f32 to vector<16x32xf32>
      %c0_20 = arith.constant 0 : index
      %c0_21 = arith.constant 0 : index
      %32 = vector.load %arg10[%c0_20, %c0_21] : memref<16x32xf32, #tpu.memory_space<vmem>>, vector<16x32xf32>
      tpu.vector_store %arg10[%c0_20, %c0_21], %31 {strides = array<i32>} : memref<16x32xf32, #tpu.memory_space<vmem>>, vector<16x32xf32>,
    } else {
    }
    %c0 = arith.constant 0 : index
    %c0_1 = arith.constant 0 : index
    %3 = vector.load %arg2[%c0, %c0_1] : memref<16x32xbf16, #tpu.memory_space<vmem>>, vector<16x32xbf16>
    %c0_2 = arith.constant 0 : index
    %c0_3 = arith.constant 0 : index
    %4 = vector.load %arg3[%c0_2, %c0_3] : memref<32x64xbf16, #tpu.memory_space<vmem>>, vector<32x64xbf16>
    %cst = arith.constant dense<0.000000e+00> : vector<16x64xf32>
    %5 = tpu.matmul %3, %4, %cst {dimension_numbers = #tpu.dot_dimension_numbers<[1], [0], [0], [1], [0, 0, 1, 1], [], []>} : vector<16x32xbf16>, vector<32x64xbf16>, vector<16x64xf32> -> vector<16x64xf32>
    %c0_4 = arith.constant 0 : index
    %c0_5 = arith.constant 0 : index
    %6 = vector.load %arg4[%c0_4, %c0_5] : memref<1x64xf32, #tpu.memory_space<vmem>>, vector<1x64xf32>
    %7 = vector.broadcast %6 : vector<1x64xf32> to vector<16x64xf32>
    %8 = arith.addf %5, %7 : vector<16x64xf32>
    %9 = arith.mulf %8, %8 : vector<16x64xf32>
    %10 = arith.mulf %8, %9 : vector<16x64xf32>
    %cst_6 = arith.constant 4.471500e-02 : f32
    %11 = vector.broadcast %cst_6 : f32 to vector<16x64xf32>
    %12 = arith.mulf %11, %10 : vector<16x64xf32>
    %13 = arith.addf %8, %12 : vector<16x64xf32>
    %cst_7 = arith.constant 0.797884583 : f32
    %14 = vector.broadcast %cst_7 : f32 to vector<16x64xf32>
    %15 = arith.mulf %14, %13 : vector<16x64xf32>
    %16 = math.tanh %15 : vector<16x64xf32>
    %cst_8 = arith.constant 1.000000e+00 : f32
    %17 = vector.broadcast %cst_8 : f32 to vector<16x64xf32>
    %18 = arith.addf %17, %16 : vector<16x64xf32>
    %cst_9 = arith.constant 5.000000e-01 : f32
    %19 = vector.broadcast %cst_9 : f32 to vector<16x64xf32>
    %20 = arith.mulf %19, %18 : vector<16x64xf32>
    %21 = arith.mulf %8, %20 : vector<16x64xf32>
    %c0_10 = arith.constant 0 : index
    %c0_11 = arith.constant 0 : index
    %22 = vector.load %arg10[%c0_10, %c0_11] : memref<16x32xf32, #tpu.memory_space<vmem>>, vector<16x32xf32>
    %23 = arith.truncf %21 : vector<16x64xf32> to vector<16x64xbf16>
    %c0_12 = arith.constant 0 : index
    %c0_13 = arith.constant 0 : index
    %24 = vector.load %arg5[%c0_12, %c0_13] : memref<64x32xbf16, #tpu.memory_space<vmem>>, vector<64x32xbf16>
    %cst_14 = arith.constant dense<0.000000e+00> : vector<16x32xf32>
    %25 = tpu.matmul %23, %24, %cst_14 {dimension_numbers = #tpu.dot_dimension_numbers<[1], [0], [0], [1], [0, 0, 1, 1], [], []>} : vector<16x64xbf16>, vector<64x32xbf16>, vector<16x32xf32> -> vector<16x32xf32>
    %26 = arith.addf %22, %25 : vector<16x32xf32>
    %c0_15 = arith.constant 0 : index
    %c0_16 = arith.constant 0 : index
    %27 = vector.load %arg10[%c0_15, %c0_16] : memref<16x32xf32, #tpu.memory_space<vmem>>, vector<16x32xf32>
    tpu.vector_store %arg10[%c0_15, %c0_16], %26 {strides = array<i32>} : memref<16x32xf32, #tpu.memory_space<vmem>>, vector<16x32xf32>,
    %c0_i32_17 = arith.constant 0 : i32
    %28 = arith.cmpi eq, %arg1, %c0_i32_17 : i32
    %29 = arith.extui %28 : i1 to i32
    %c0_i32_18 = arith.constant 0 : i32
    %30 = arith.cmpi ne, %29, %c0_i32_18 : i32
    scf.if %30 {
      %c0_19 = arith.constant 0 : index
      %c0_20 = arith.constant 0 : index
      %31 = vector.load %arg10[%c0_19, %c0_20] : memref<16x32xf32, #tpu.memory_space<vmem>>, vector<16x32xf32>
      %c0_21 = arith.constant 0 : index
      %c0_22 = arith.constant 0 : index
      %32 = vector.load %arg6[%c0_21, %c0_22] : memref<1x32xf32, #tpu.memory_space<vmem>>, vector<1x32xf32>
      %33 = vector.broadcast %32 : vector<1x32xf32> to vector<16x32xf32>
      %34 = arith.addf %31, %33 : vector<16x32xf32>
      %c0_23 = arith.constant 0 : index
      %c0_24 = arith.constant 0 : index
      %35 = vector.load %arg2[%c0_23, %c0_24] : memref<16x32xbf16, #tpu.memory_space<vmem>>, vector<16x32xbf16>
      %36 = arith.extf %35 : vector<16x32xbf16> to vector<16x32xf32>
      %37 = arith.addf %34, %36 : vector<16x32xf32>
      %cst_25 = arith.constant dense<0.000000e+00> : vector<16xf32>
      %38 = vector.multi_reduction <add>, %37, %cst_25 [1] : vector<16x32xf32> to vector<16xf32>
      %39 = vector.shape_cast %38 : vector<16xf32> to vector<16x1xf32>
      %cst_26 = arith.constant 3.200000e+01 : f32
      %40 = vector.broadcast %cst_26 : f32 to vector<16x1xf32>
      %41 = arith.divf %39, %40 : vector<16x1xf32>
      %42 = vector.broadcast %41 : vector<16x1xf32> to vector<16x32xf32>
      %43 = arith.subf %37, %42 : vector<16x32xf32>
      %44 = arith.mulf %43, %43 : vector<16x32xf32>
      %cst_27 = arith.constant dense<0.000000e+00> : vector<16xf32>
      %45 = vector.multi_reduction <add>, %44, %cst_27 [1] : vector<16x32xf32> to vector<16xf32>
      %46 = vector.shape_cast %45 : vector<16xf32> to vector<16x1xf32>
      %cst_28 = arith.constant 3.200000e+01 : f32
      %47 = vector.broadcast %cst_28 : f32 to vector<16x1xf32>
      %48 = arith.divf %46, %47 : vector<16x1xf32>
      %49 = vector.broadcast %41 : vector<16x1xf32> to vector<16x32xf32>
      %50 = arith.subf %37, %49 : vector<16x32xf32>
      %cst_29 = arith.constant 9.99999996E-13 : f32
      %51 = vector.broadcast %cst_29 : f32 to vector<16x1xf32>
      %52 = arith.addf %48, %51 : vector<16x1xf32>
      %53 = math.rsqrt %52 : vector<16x1xf32>
      %54 = vector.broadcast %53 : vector<16x1xf32> to vector<16x32xf32>
      %55 = arith.mulf %50, %54 : vector<16x32xf32>
      %c0_30 = arith.constant 0 : index
      %c0_31 = arith.constant 0 : index
      %56 = vector.load %arg7[%c0_30, %c0_31] : memref<1x32xf32, #tpu.memory_space<vmem>>, vector<1x32xf32>
      %57 = vector.broadcast %56 : vector<1x32xf32> to vector<16x32xf32>
      %58 = arith.mulf %55, %57 : vector<16x32xf32>
      %c0_32 = arith.constant 0 : index
      %c0_33 = arith.constant 0 : index
      %59 = vector.load %arg8[%c0_32, %c0_33] : memref<1x32xf32, #tpu.memory_space<vmem>>, vector<1x32xf32>
      %60 = vector.broadcast %59 : vector<1x32xf32> to vector<16x32xf32>
      %61 = arith.addf %58, %60 : vector<16x32xf32>
      %62 = arith.truncf %61 : vector<16x32xf32> to vector<16x32xbf16>
      %c0_34 = arith.constant 0 : index
      %c0_35 = arith.constant 0 : index
      %63 = vector.load %arg9[%c0_34, %c0_35] : memref<16x32xbf16, #tpu.memory_space<vmem>>, vector<16x32xbf16>
      tpu.vector_store %arg9[%c0_34, %c0_35], %62 {strides = array<i32>} : memref<16x32xbf16, #tpu.memory_space<vmem>>, vector<16x32xbf16>,
    } else {
    }
    return
  }
  func.func @transform_0(%arg0: i32, %arg1: i32) -> (i32, i32) {
    %c0_i32 = arith.constant 0 : i32
    %c0_i32_0 = arith.constant 0 : i32
    return %arg0, %c0_i32 : i32, i32
  }
  func.func @transform_1(%arg0: i32, %arg1: i32) -> (i32, i32) {
    %c0_i32 = arith.constant 0 : i32
    %c0_i32_0 = arith.constant 0 : i32
    return %c0_i32, %arg1 : i32, i32
  }
  func.func @transform_2(%arg0: i32, %arg1: i32) -> (i32, i32) {
    %c0_i32 = arith.constant 0 : i32
    %c0_i32_0 = arith.constant 0 : i32
    return %c0_i32, %arg1 : i32, i32
  }
  func.func @transform_3(%arg0: i32, %arg1: i32) -> (i32, i32) {
    %c0_i32 = arith.constant 0 : i32
    %c0_i32_0 = arith.constant 0 : i32
    return %arg1, %c0_i32 : i32, i32
  }
  func.func @transform_4(%arg0: i32, %arg1: i32) -> (i32, i32) {
    %c0_i32 = arith.constant 0 : i32
    %c0_i32_0 = arith.constant 0 : i32
    %c0_i32_1 = arith.constant 0 : i32
    return %c0_i32, %c0_i32_0 : i32, i32
  }
  func.func @transform_5(%arg0: i32, %arg1: i32) -> (i32, i32) {
    %c0_i32 = arith.constant 0 : i32
    %c0_i32_0 = arith.constant 0 : i32
    %c0_i32_1 = arith.constant 0 : i32
    return %c0_i32, %c0_i32_0 : i32, i32
  }
  func.func @transform_6(%arg0: i32, %arg1: i32) -> (i32, i32) {
    %c0_i32 = arith.constant 0 : i32
    %c0_i32_0 = arith.constant 0 : i32
    %c0_i32_1 = arith.constant 0 : i32
    return %c0_i32, %c0_i32_0 : i32, i32
  }
  func.func @transform_7(%arg0: i32, %arg1: i32) -> (i32, i32) {
    %c0_i32 = arith.constant 0 : i32
    %c0_i32_0 = arith.constant 0 : i32
    return %arg0, %c0_i32 : i32, i32
  }
}

</mosaic_0001>

<bundles_post_ra>
// kernel: bert_for_sequence_classification.10
= control target key start
LH: loop header
LB: loop body
LE: loop exit
PB: predicated region body
PF: predicated region fallthrough
CT: control target
= control target key end

     0   :  { %vm19_vm0 = vcmask 785408   ;;  %v151_v0 = vmov 0.0   ;;  %vm152_vm1 = vmmov 0   ;;  %vm47_vm2 = vcmask 261120   ;;  %s195_s1 = inlined_call_operand.vmem [shape: bf16[32,96], index: 1, kind: input, shape index: {}]   ;;  %s196_s0 = inlined_call_operand.vmem [shape: bf16[16,32], index: 0, kind: input, shape index: {}]   ;;  %s197_s2 = inlined_call_operand.vmem [shape: f32[1,96], index: 2, kind: input, shape index: {}]   ;;  %s198_s3 = inlined_call_operand.vmem [shape: bf16[16,96], index: 3, kind: output, shape index: {}]  }
   0x1   :  { %138 = vmatprep.subr.bf16.mxu0 %v151_v0  ;;  %v148_v1 = vld [vmem:[%s195_s1] sm:$0xff]   ;;  %142 = vmatprep.mubr.msk.bf16.mxu0 %vm152_vm1, %v151_v0  ;;  %20 = vst.msk [vmem:[#allocation2] sm:$0xff] %vm19_vm0, %v151_v0  ;;  %21 = vst.msk [vmem:[#allocation2 + $0x8] sm:$0xff] %vm19_vm0, %v151_v0  ;;  %v149_v2 = vld [vmem:[%s195_s1 + $0x8] sm:$0xff]   ;;  %vm119_vm3 = vcmask 781312  }
   0x2   :  { %139 = vmatpush3.bf16.msra.mxu0 %v148_v1  ;;  %v150_v3 = vld [vmem:[%s196_s0] sm:$0xff]  }
   0x3   :  { %140 = vmatprep.subr.bf16.mxu0 %v151_v0  ;;  %v130_v12 = vld [vmem:[%s197_s2] ss:$0 sm:$0xff] }
   0x6   :  { %141 = vmatpush3.bf16.msra.mxu0 %v149_v2 }
   0x8   :  { %v22_v4 = vld [vmem:[#allocation2] sm:$0xff]  ;;  %v23_v6 = vld [vmem:[#allocation2 + $0x8] sm:$0xff] }
   0x9   :  { %143 = vmatmul.mubr.msk.bf16.vlgmr.msra.gmra.mrb[0].mxu0 %vm47_vm2, %v150_v3 }
  0xdc   :  { %v85_v5 = vpop.f32.mrb[0].mxu0 }
  0xdd   :  { %v92_v7 = vadd.f32 %v85_v5, %v22_v4  ;;  %v144_v8 = vpop.f32.mrb[1].mxu0 }
  0xde   :  { %v88_v9 = vpop.f32.mrb[2].mxu0 }
  0xdf   :  { %95 = vst.msk [vmem:[#allocation2] sm:$0xff] %vm19_vm0, %v92_v7  ;;  %v93_v10 = vadd.f32 %v88_v9, %v23_v6  ;;  %v145_v11 = vpop.f32.mrb[3].mxu0 }
  0xe1   :  { %96 = vst.msk [vmem:[#allocation2 + $0x8] sm:$0xff] %vm19_vm0, %v93_v10 }
  0xe6   :  { %v100_v13 = vld [vmem:[#allocation2] sm:$0xff] }
  0xe7   :  { %v109_v14 = vadd.f32 %v130_v12, %v100_v13 }
  0xe8   :  { %v101_v15 = vld [vmem:[#allocation2 + $0x8] sm:$0xff] }
  0xe9   :  { %v133_v16 = vpack.c.bf16 %v109_v14, %v109_v14  ;;  %v110_v17 = vadd.f32 %v130_v12, %v101_v15 }
  0xeb   :  { %120 = vst.msk [vmem:[%s198_s3] sm:$0xf] %vm119_vm3, %v133_v16  ;;  %v134_v18 = vpack.c.bf16 %v110_v17, %v110_v17 }
  0xed   :  { %121 = vst.msk [vmem:[%s198_s3 + $0x4] sm:$0xf] %vm119_vm3, %v134_v18 }

// kernel: bert_for_sequence_classification.9
= control target key start
LH: loop header
LB: loop body
LE: loop exit
PB: predicated region body
PF: predicated region fallthrough
CT: control target
= control target key end

     0   :  { %vm16_vm0 = vcmask 261120   ;;  %vm70_vm1 = vcmask 257024   ;;  %s129_s0 = inlined_call_operand.vmem [shape: f32[16,32], index: 0, kind: input, shape index: {}]   ;;  %s130_s1 = inlined_call_operand.vmem [shape: f32[1,32], index: 1, kind: input, shape index: {}]   ;;  %s131_s2 = inlined_call_operand.vmem [shape: f32[1,32], index: 2, kind: input, shape index: {}]   ;;  %s132_s3 = inlined_call_operand.vmem [shape: bf16[16,32], index: 3, kind: output, shape index: {}]  }
   0x1   :  { %v14_v0 = vld [vmem:[%s129_s0] sm:$0xff]  ;;  %v15_v1 = vld [vmem:[%s129_s0 + $0x8] sm:$0xff] }
   0x2   :  { %v17_v2 = vsel %vm16_vm0, %v14_v0, 0.0  ;;  %v20_v3 = vsel %vm16_vm0, %v15_v1, 0.0  ;;  %v77_v21 = vld [vmem:[%s130_s1] ss:$0 sm:$0xff] }
   0x3   :  { %18 = vadd.xlane.f32.xlu0 %v17_v2  ;;  %v78_v23 = vld [vmem:[%s131_s2] ss:$0 sm:$0xff] }
   0x7   :  { %21 = vadd.xlane.f32.xlu0 %v20_v3 }
  0x90   :  { %v19_v4 = vpop.xlane.xlu0 %18 }
  0x91   :  { %v24_v5 = vmul.f32 0.03125, %v19_v4 }
  0x93   :  { %v26_v6 = vsub.f32 %v14_v0, %v24_v5 }
  0x94   :  { %v22_v7 = vpop.xlane.xlu0 %21 }
  0x95   :  { %v25_v8 = vmul.f32 0.03125, %v22_v7  ;;  %v28_v9 = vmul.f32 %v26_v6, %v26_v6 }
  0x97   :  { %v27_v10 = vsub.f32 %v15_v1, %v25_v8  ;;  %v30_v11 = vsel %vm16_vm0, %v28_v9, 0.0 }
  0x98   :  { %31 = vadd.xlane.f32.xlu1 %v30_v11 }
  0x99   :  { %v29_v12 = vmul.f32 %v27_v10, %v27_v10 }
  0x9b   :  { %v33_v13 = vsel %vm16_vm0, %v29_v12, 0.0 }
  0x9c   :  { %34 = vadd.xlane.f32.xlu1 %v33_v13 }
 0x125   :  { %v32_v14 = vpop.xlane.xlu1 %31 }
 0x126   :  { %v36_v15 = vmul.f32 0.03125, %v32_v14 }
 0x128   :  { %v38_v16 = vadd.f32 1e-12, %v36_v15 }
 0x129   :  { %v35_v17 = vpop.xlane.xlu1 %34 }
 0x12a   :  { %83 = vrsqrt.f32 %v38_v16  ;;  %v37_v18 = vmul.f32 0.03125, %v35_v17 }
 0x12c   :  { %v39_v19 = vadd.f32 1e-12, %v37_v18 }
 0x12e   :  { %85 = vrsqrt.f32 %v39_v19 }
 0x134   :  { %v84_v20 = vpop.eup %83 }
 0x135   :  { %v42_v22 = vmul.f32 %v84_v20, %v26_v6 }
 0x137   :  { %v51_v24 = vmul.f32 %v77_v21, %v42_v22 }
 0x138   :  { %v86_v25 = vpop.eup %85 }
 0x139   :  { %v60_v26 = vadd.f32 %v78_v23, %v51_v24  ;;  %v43_v27 = vmul.f32 %v86_v25, %v27_v10 }
 0x13b   :  { %v81_v28 = vpack.c.bf16 %v60_v26, %v60_v26  ;;  %v52_v29 = vmul.f32 %v77_v21, %v43_v27 }
 0x13d   :  { %71 = vst.msk [vmem:[%s132_s3] sm:$0xf] %vm70_vm1, %v81_v28  ;;  %v61_v30 = vadd.f32 %v78_v23, %v52_v29 }
 0x13f   :  { %v82_v31 = vpack.c.bf16 %v61_v30, %v61_v30 }
 0x141   :  { %72 = vst.msk [vmem:[%s132_s3 + $0x4] sm:$0xf] %vm70_vm1, %v82_v31 }

// kernel: bert_for_sequence_classification.12
= control target key start
LH: loop header
LB: loop body
LE: loop exit
PB: predicated region body
PF: predicated region fallthrough
CT: control target
= control target key end

     0   :  { %vm28_vm0 = vcmask 261120   ;;  %v220_v0 = vmov 0.0   ;;  %vm221_vm1 = vmmov 0   ;;  %vm178_vm2 = vcmask 257024   ;;  %s293_s1 = inlined_call_operand.vmem [shape: bf16[32,32], index: 1, kind: input, shape index: {}]   ;;  %s294_s0 = inlined_call_operand.vmem [shape: bf16[16,32], index: 0, kind: input, shape index: {}]   ;;  %s295_s3 = inlined_call_operand.vmem [shape: bf16[16,32], index: 3, kind: input, shape index: {}]   ;;  %s296_s2 = inlined_call_operand.vmem [shape: f32[1,32], index: 2, kind: input, shape index: {}]   ;;  %s297_s4 = inlined_call_operand.vmem [shape: f32[1,32], index: 4, kind: input, shape index: {}]   ;;  %s298_s5 = inlined_call_operand.vmem [shape: f32[1,32], index: 5, kind: input, shape index: {}]   ;;  %s299_s6 = inlined_call_operand.vmem [shape: bf16[16,32], index: 6, kind: output, shape index: {}]  }
   0x1   :  { %203 = vmatprep.subr.bf16.mxu0 %v220_v0  ;;  %v213_v1 = vld [vmem:[%s293_s1] sm:$0xff]   ;;  %207 = vmatprep.mubr.msk.bf16.mxu0 %vm221_vm1, %v220_v0  ;;  %29 = vst.msk [vmem:[#allocation2] sm:$0xff] %vm28_vm0, %v220_v0  ;;  %30 = vst.msk [vmem:[#allocation2 + $0x8] sm:$0xff] %vm28_vm0, %v220_v0  ;;  %v214_v2 = vld [vmem:[%s293_s1 + $0x8] sm:$0xff]  }
   0x2   :  { %204 = vmatpush3.bf16.msra.mxu0 %v213_v1  ;;  %v215_v3 = vld [vmem:[%s294_s0] sm:$0xff]  }
   0x3   :  { %205 = vmatprep.subr.bf16.mxu0 %v220_v0  ;;  %v197_v12 = vld [vmem:[%s295_s3] sm:$0xff]  }
   0x4   :  { %v189_v13 = vld [vmem:[%s296_s2] ss:$0 sm:$0xff]  ;;  %v198_v14 = vunpack.c.l.bf16 %v197_v12  ;;  %v199_v17 = vunpack.c.h.bf16 %v197_v12 }
   0x5   :  { %v190_v41 = vld [vmem:[%s297_s4] ss:$0 sm:$0xff] }
   0x6   :  { %206 = vmatpush3.bf16.msra.mxu0 %v214_v2  ;;  %v191_v43 = vld [vmem:[%s298_s5] ss:$0 sm:$0xff] }
   0x8   :  { %v31_v4 = vld [vmem:[#allocation2] sm:$0xff]  ;;  %v32_v6 = vld [vmem:[#allocation2 + $0x8] sm:$0xff] }
   0x9   :  { %208 = vmatmul.mubr.msk.bf16.vlgmr.msra.gmra.mrb[0].mxu0 %vm28_vm0, %v215_v3 }
  0xdc   :  { %v94_v5 = vpop.f32.mrb[0].mxu0 }
  0xdd   :  { %v101_v7 = vadd.f32 %v94_v5, %v31_v4  ;;  %v209_v8 = vpop.f32.mrb[1].mxu0 }
  0xde   :  { %v97_v9 = vpop.f32.mrb[2].mxu0 }
  0xdf   :  { %103 = vst.msk [vmem:[#allocation2] sm:$0xff] %vm28_vm0, %v101_v7  ;;  %v102_v10 = vadd.f32 %v97_v9, %v32_v6  ;;  %v210_v11 = vpop.f32.mrb[3].mxu0 }
  0xe1   :  { %104 = vst.msk [vmem:[#allocation2 + $0x8] sm:$0xff] %vm28_vm0, %v102_v10 }
  0xe6   :  { %v108_v15 = vld [vmem:[#allocation2] sm:$0xff] }
  0xe7   :  { %v117_v16 = vadd.f32 %v189_v13, %v108_v15 }
  0xe8   :  { %v109_v18 = vld [vmem:[#allocation2 + $0x8] sm:$0xff] }
  0xe9   :  { %v123_v19 = vadd.f32 %v198_v14, %v117_v16  ;;  %v118_v20 = vadd.f32 %v189_v13, %v109_v18 }
  0xeb   :  { %v125_v21 = vsel %vm28_vm0, %v123_v19, 0.0  ;;  %v124_v22 = vadd.f32 %v199_v17, %v118_v20 }
  0xec   :  { %126 = vadd.xlane.f32.xlu0 %v125_v21 }
  0xed   :  { %v128_v23 = vsel %vm28_vm0, %v124_v22, 0.0 }
  0xf0   :  { %129 = vadd.xlane.f32.xlu0 %v128_v23 }
 0x179   :  { %v127_v24 = vpop.xlane.xlu0 %126 }
 0x17a   :  { %v132_v25 = vmul.f32 0.03125, %v127_v24 }
 0x17c   :  { %v134_v26 = vsub.f32 %v123_v19, %v132_v25 }
 0x17d   :  { %v130_v27 = vpop.xlane.xlu0 %129 }
 0x17e   :  { %v133_v28 = vmul.f32 0.03125, %v130_v27  ;;  %v136_v29 = vmul.f32 %v134_v26, %v134_v26 }
 0x180   :  { %v135_v30 = vsub.f32 %v124_v22, %v133_v28  ;;  %v138_v31 = vsel %vm28_vm0, %v136_v29, 0.0 }
 0x181   :  { %139 = vadd.xlane.f32.xlu1 %v138_v31 }
 0x182   :  { %v137_v32 = vmul.f32 %v135_v30, %v135_v30 }
 0x184   :  { %v141_v33 = vsel %vm28_vm0, %v137_v32, 0.0 }
 0x185   :  { %142 = vadd.xlane.f32.xlu1 %v141_v33 }
 0x20e   :  { %v140_v34 = vpop.xlane.xlu1 %139 }
 0x20f   :  { %v144_v35 = vmul.f32 0.03125, %v140_v34 }
 0x211   :  { %v146_v36 = vadd.f32 1e-12, %v144_v35 }
 0x212   :  { %v143_v37 = vpop.xlane.xlu1 %142 }
 0x213   :  { %216 = vrsqrt.f32 %v146_v36  ;;  %v145_v38 = vmul.f32 0.03125, %v143_v37 }
 0x215   :  { %v147_v39 = vadd.f32 1e-12, %v145_v38 }
 0x217   :  { %218 = vrsqrt.f32 %v147_v39 }
 0x21d   :  { %v217_v40 = vpop.eup %216 }
 0x21e   :  { %v150_v42 = vmul.f32 %v217_v40, %v134_v26 }
 0x220   :  { %v159_v44 = vmul.f32 %v190_v41, %v150_v42 }
 0x221   :  { %v219_v45 = vpop.eup %218 }
 0x222   :  { %v168_v46 = vadd.f32 %v191_v43, %v159_v44  ;;  %v151_v47 = vmul.f32 %v219_v45, %v135_v30 }
 0x224   :  { %v194_v48 = vpack.c.bf16 %v168_v46, %v168_v46  ;;  %v160_v49 = vmul.f32 %v190_v41, %v151_v47 }
 0x226   :  { %179 = vst.msk [vmem:[%s299_s6] sm:$0xf] %vm178_vm2, %v194_v48  ;;  %v169_v50 = vadd.f32 %v191_v43, %v160_v49 }
 0x228   :  { %v195_v51 = vpack.c.bf16 %v169_v50, %v169_v50 }
 0x22a   :  { %180 = vst.msk [vmem:[%s299_s6 + $0x4] sm:$0xf] %vm178_vm2, %v195_v51 }

// kernel: bert_for_sequence_classification.11
= control target key start
LH: loop header
LB: loop body
LE: loop exit
PB: predicated region body
PF: predicated region fallthrough
CT: control target
= control target key end

     0   :  { %s1113_s15 = smov 0   ;;  %s1115_s16 = smov 0   ;;  %s1236_s0 = inlined_call_operand.vmem [shape: bf16[2,4,8,8], index: 0, kind: input, shape index: {}]   ;;  %s1237_s1 = inlined_call_operand.vmem [shape: bf16[2,4,8,8], index: 1, kind: input, shape index: {}]   ;;  %s1238_s2 = inlined_call_operand.vmem [shape: bf16[2,4,8,8], index: 2, kind: input, shape index: {}]   ;;  %s1239_s3 = inlined_call_operand.vmem [shape: f32[2,1,8], index: 3, kind: input, shape index: {}]   ;;  %s1240_s4 = inlined_call_operand.vmem [shape: bf16[2,8,32], index: 4, kind: output, shape index: {}]  }
   0x1   :  { %s1117_s17 = smov 0  }
   0x2 LB: > { %s26_s18 = sadd.s32 1, %s1077_s16  ;;  %p919_p0 = scmp.ge.s32.totalorder %s1081_s17, 1  ;;  %s1081_s17 = sphi %s1117_s17, %s14_s17   ;;  %s1077_s16 = sphi %s1115_s16, %s1242_s16   ;;  %s1073_s15 = sphi %s1113_s15, %s1241_s15  }
   0x3   : > { %p28_p1 = scmp.ge.s32.totalorder %s26_s18, 2  ;;  %p225_p2 = scmp.lt.s32.totalorder %s1081_s17, 3 }
   0x5   : > { %s1244_s18 = smov (%p28_p1, %s26_s18), 0  ;;  %p226_p3 = pnand %p919_p0, %p225_p2 }
   0x6   : > { %p279_p4 = scmp.lt.s32.totalorder (!%p226_p3), %s1073_s15, 1  ;;  %v1083_v0 = vmov (!%p226_p3), 0.0   ;;  %vm1084_vm0 = vmmov (!%p226_p3), 0   ;;  %vm329_vm1 = vcmask (!%p226_p3), 64512   ;;  %vm393_vm2 = vcmask (!%p226_p3), 1043456   ;;  %s1085_s6 = smov (!%p226_p3), 8  }
   0x7   : > { %229 = sbr.rel (%p226_p3) target bundleno = 1445 (0x5a5), region = 36  ;;  %966 = vmatprep.subr.bf16.mxu0 (!%p226_p3), %v1083_v0  ;;  %968 = vmatprep.mubr.msk.bf16.mxu0 (!%p226_p3), %vm1084_vm0, %v1083_v0  ;;  %s1086_s7 = smov (!%p226_p3), 16   ;;  %vm786_vm3 = vcmask (!%p226_p3), 130048   ;;  %vm788_vm4 = vcmask (!%p226_p3), 195584   ;;  %vm791_vm5 = vcmask (!%p226_p3), 257024  }
   0x8   : > { %972 = vmatprep.subr.bf16.mxu1 (!%p226_p3), %v1083_v0  ;;  %974 = vmatprep.mubr.msk.bf16.mxu1 (!%p226_p3), %vm1084_vm0, %v1083_v0  ;;  %s1087_s8 = smov (!%p226_p3), 24  }
   0xe   : > { %s1246_s15 = smov (!%p279_p4, %s1073_s15), 1 }
   0xf   : > { %s947_s19 = sshll.u32 %s1246_s15, 4  ;;  %s310_s28 = scalar_lea.vmem %s1239_s3, %s1246_s15 }
  0x10   : > { %s1143_s22 = scalar_lea.vmem %s1237_s1, %s947_s19  ;;  %s1150_s25 = scalar_lea.vmem %s1236_s0, %s947_s19  ;;  %v1161_v5 = vld [vmem:[%s310_s28] ss:$0 sm:$0xff] }
  0x11   : > { %v327_v1 = vld [vmem:[%s1143_s22] sm:$0xf]  ;;  %s1169_s5 = scalar_lea.vmem %s1238_s2, %s947_s19  ;;  %v931_v21 = vld [vmem:[%s1143_s22 + $0x4] sm:$0xf]  ;;  %v936_v25 = vld [vmem:[%s1143_s22 + $0x8] sm:$0xf] }
  0x12   : > { %v334_v2 = vsel %vm329_vm1, %v327_v1, 0  ;;  %v326_v3 = vld [vmem:[%s1150_s25] sm:$0xf]  ;;  %v447_v24 = vsel %vm329_vm1, %v931_v21, 0  ;;  %v930_v26 = vld [vmem:[%s1150_s25 + $0x4] sm:$0xf] }
  0x13   : > { %967 = vmatpush3.bf16.xpose.msra.mxu0 %v334_v2  ;;  %v328_v17 = vld [vmem:[%s1169_s5] sm:$0xf]  ;;  %v559_v27 = vsel %vm329_vm1, %v936_v25, 0  ;;  %v941_v28 = vld [vmem:[%s1143_s22 + $0xc] sm:$0xf]  ;;  %s926_s9 = sshll.u32 %s1246_s15, 2 }
  0x14   : > { %984 = vmatprep.subr.bf16.mxu0 %v1083_v0  ;;  %v395_v18 = vsel %vm393_vm2, %v328_v17, 0  ;;  %v935_v29 = vld [vmem:[%s1150_s25 + $0x8] sm:$0xf]  ;;  %v671_v30 = vsel %vm329_vm1, %v941_v28, 0  ;;  %v940_v31 = vld [vmem:[%s1150_s25 + $0xc] sm:$0xf]  ;;  %s317_s12 = scalar_lea.vmem %s1240_s4, %s926_s9 }
  0x15   : > { %973 = vmatpush3.bf16.msra.mxu1 %v395_v18 }
  0x16   : > { %978 = vmatprep.subr.bf16.mxu1 %v1083_v0 }
  0x1a   : > { %969 = vmatmul.mubr.msk.bf16.vlgmr.msra.gmra.mrb[0].mxu0 %vm329_vm1, %v326_v3 }
  0x1b   : > { %986 = vmatprep.mubr.msk.bf16.mxu0 %vm1084_vm0, %v1083_v0 }
  0xed   : > { %v370_v4 = vpop.f32.mrb[0].mxu0 }
  0xee   : > { %v376_v6 = vmul.f32 0.35355338, %v370_v4  ;;  %v970_v7 = vpop.f32.mrb[1].mxu0 }
  0xef   : > { %v373_v8 = vpop.f32.mrb[2].mxu0 }
  0xf0   : > { %v971_v9 = vpop.f32.mrb[3].mxu0  ;;  %v377_v10 = vadd.f32 %v1161_v5, %v376_v6 }
  0xf1   : > { %v932_v9 = vld [vmem:[%s1169_s5 + $0x4] sm:$0xf] }
  0xf2   : > { %v378_v11 = vsel %vm329_vm1, %v377_v10, -inf }
  0xf3   : > { %379 = vmax.xlane.f32.xlu0 %v378_v11 }
 0x180   : > { %v380_v12 = vpop.xlane.xlu0 %379 }
 0x181   : > { %v381_v13 = vsub.f32 %v377_v10, %v380_v12  ;;  %v507_v10 = vsel %vm393_vm2, %v932_v9, 0 }
 0x182   : > { %985 = vmatpush3.bf16.msra.mxu0 %v507_v10 }
 0x183   : > { %v382_v14 = vmul.f32 1.442695, %v381_v13  ;;  %996 = vmatprep.subr.bf16.mxu0 %v1083_v0 }
 0x185   : > { %1043 = vpow2.f32 %v382_v14  ;;  %v937_v14 = vld [vmem:[%s1169_s5 + $0x8] sm:$0xf] }
 0x186   : > { %v619_v17 = vsel %vm393_vm2, %v937_v14, 0 }
 0x18f   : > { %v1044_v15 = vpop.eup %1043 }
 0x190   : > { %v384_v16 = vsel %vm329_vm1, %v1044_v15, 0.0 }
 0x191   : > { %385 = vadd.xlane.f32.xlu0 %v384_v16 }
 0x21e   : > { %v386_v19 = vpop.xlane.xlu0 %385 }
 0x21f   : > { %1045 = vrcp.f32 %v386_v19 }
 0x229   : > { %v1046_v20 = vpop.eup %1045 }
 0x22a   : > { %v388_v22 = vmul.f32 %v1046_v20, %v1044_v15  ;;  %v942_v20 = vld [vmem:[%s1169_s5 + $0xc] sm:$0xf] }
 0x22c   : > { %v389_v23 = vpack.c.bf16 %v388_v22, %v388_v22 }
 0x22e   : > { %975 = vmatmul.mubr.msk.bf16.vlgmr.msra.gmra.mrb[0].mxu1 %vm329_vm1, %v389_v23  ;;  %v731_v23 = vsel %vm393_vm2, %v942_v20, 0 }
 0x22f   : > { %979 = vmatpush3.bf16.xpose.msra.mxu1 %v447_v24  ;;  %980 = vmatprep.mubr.msk.bf16.mxu1 %vm1084_vm0, %v1083_v0 }
 0x230   : > { %990 = vmatprep.subr.bf16.mxu1 %v1083_v0 }
 0x236   : > { %981 = vmatmul.mubr.msk.bf16.vlgmr.msra.gmra.mrb[4].mxu1 %vm329_vm1, %v930_v26 }
 0x237   : > { %991 = vmatpush3.bf16.xpose.msra.mxu1 %v559_v27  ;;  %992 = vmatprep.mubr.msk.bf16.mxu1 %vm1084_vm0, %v1083_v0 }
 0x238   : > { %1002 = vmatprep.subr.bf16.mxu1 %v1083_v0 }
 0x23e   : > { %993 = vmatmul.mubr.msk.bf16.vlgmr.msra.gmra.mrb[8].mxu1 %vm329_vm1, %v935_v29 }
 0x23f   : > { %1003 = vmatpush3.bf16.xpose.msra.mxu1 %v671_v30  ;;  %1004 = vmatprep.mubr.msk.bf16.mxu1 %vm1084_vm0, %v1083_v0 }
 0x246   : > { %1005 = vmatmul.mubr.msk.bf16.vlgmr.msra.gmra.mrb[12].mxu1 %vm329_vm1, %v940_v31 }
 0x301   : > { %v1195_v32 = vpop.f32.mrb[0].mxu1 }
 0x302   : > { %v976_v33 = vpop.f32.mrb[1].mxu1 }
 0x303   : > { %v434_v34 = vpop.f32.mrb[2].mxu1 }
 0x304   : > { %v977_v35 = vpop.f32.mrb[3].mxu1 }
 0x309   : > { %v483_v36 = vpop.f32.mrb[4].mxu1 }
 0x30a   : > { %v489_v37 = vmul.f32 0.35355338, %v483_v36  ;;  %v982_v38 = vpop.f32.mrb[5].mxu1 }
 0x30b   : > { %v486_v39 = vpop.f32.mrb[6].mxu1 }
 0x30c   : > { %v983_v40 = vpop.f32.mrb[7].mxu1  ;;  %v490_v41 = vadd.f32 %v1161_v5, %v489_v37 }
 0x30e   : > { %v491_v42 = vsel %vm329_vm1, %v490_v41, -inf }
 0x30f   : > { %492 = vmax.xlane.f32.xlu1 %v491_v42 }
 0x311   : > { %v595_v43 = vpop.f32.mrb[8].mxu1 }
 0x312   : > { %v601_v44 = vmul.f32 0.35355338, %v595_v43  ;;  %v994_v45 = vpop.f32.mrb[9].mxu1 }
 0x313   : > { %v598_v46 = vpop.f32.mrb[10].mxu1 }
 0x314   : > { %v995_v47 = vpop.f32.mrb[11].mxu1  ;;  %v602_v48 = vadd.f32 %v1161_v5, %v601_v44 }
 0x316   : > { %v603_v49 = vsel %vm329_vm1, %v602_v48, -inf }
 0x317   : > { %604 = vmax.xlane.f32.xlu1 %v603_v49 }
 0x319   : > { %v707_v50 = vpop.f32.mrb[12].mxu1 }
 0x31a   : > { %v713_v51 = vmul.f32 0.35355338, %v707_v50  ;;  %v1006_v52 = vpop.f32.mrb[13].mxu1 }
 0x31b   : > { %v710_v53 = vpop.f32.mrb[14].mxu1 }
 0x31c   : > { %v1007_v54 = vpop.f32.mrb[15].mxu1  ;;  %v714_v55 = vadd.f32 %v1161_v5, %v713_v51 }
 0x31e   : > { %v715_v56 = vsel %vm329_vm1, %v714_v55, -inf }
 0x31f   : > { %716 = vmax.xlane.f32.xlu0 %v715_v56 }
 0x39c   : > { %v493_v57 = vpop.xlane.xlu1 %492 }
 0x39d   : > { %v494_v58 = vsub.f32 %v490_v41, %v493_v57 }
 0x39f   : > { %v495_v59 = vmul.f32 1.442695, %v494_v58 }
 0x3a1   : > { %1047 = vpow2.f32 %v495_v59 }
 0x3a4   : > { %v605_v60 = vpop.xlane.xlu1 %604 }
 0x3a5   : > { %v606_v61 = vsub.f32 %v602_v48, %v605_v60 }
 0x3a7   : > { %v607_v62 = vmul.f32 1.442695, %v606_v61 }
 0x3a9   : > { %1049 = vpow2.f32 %v607_v62 }
 0x3ab   : > { %v1048_v63 = vpop.eup %1047 }
 0x3ac   : > { %v717_v1 = vpop.xlane.xlu0 %716  ;;  %v497_v2 = vsel %vm329_vm1, %v1048_v63, 0.0 }
 0x3ad   : > { %v718_v3 = vsub.f32 %v714_v55, %v717_v1  ;;  %498 = vadd.xlane.f32.xlu1 %v497_v2 }
 0x3af   : > { %v719_v4 = vmul.f32 1.442695, %v718_v3 }
 0x3b1   : > { %1051 = vpow2.f32 %v719_v4 }
 0x3b3   : > { %v1050_v5 = vpop.eup %1049 }
 0x3b4   : > { %v609_v6 = vsel %vm329_vm1, %v1050_v5, 0.0 }
 0x3b5   : > { %610 = vadd.xlane.f32.xlu0 %v609_v6 }
 0x3bb   : > { %v1052_v7 = vpop.eup %1051 }
 0x3bc   : > { %v721_v8 = vsel %vm329_vm1, %v1052_v7, 0.0 }
 0x3bd   : > { %722 = vadd.xlane.f32.xlu1 %v721_v8 }
 0x43a   : > { %v499_v11 = vpop.xlane.xlu1 %498 }
 0x43b   : > { %1053 = vrcp.f32 %v499_v11 }
 0x442   : > { %v611_v12 = vpop.xlane.xlu0 %610 }
 0x443   : > { %1055 = vrcp.f32 %v611_v12 }
 0x445   : > { %v1054_v13 = vpop.eup %1053 }
 0x446   : > { %v501_v15 = vmul.f32 %v1054_v13, %v1048_v63 }
 0x448   : > { %v502_v16 = vpack.c.bf16 %v501_v15, %v501_v15 }
 0x44a   : > { %987 = vmatmul.mubr.msk.bf16.vlgmr.msra.gmra.mrb[4].mxu0 %vm329_vm1, %v502_v16  ;;  %v723_v18 = vpop.xlane.xlu1 %722 }
 0x44b   : > { %997 = vmatpush3.bf16.msra.mxu0 %v619_v17  ;;  %1057 = vrcp.f32 %v723_v18  ;;  %998 = vmatprep.mubr.msk.bf16.mxu0 %vm1084_vm0, %v1083_v0 }
 0x44c   : > { %1008 = vmatprep.subr.bf16.mxu0 %v1083_v0 }
 0x44d   : > { %v1056_v19 = vpop.eup %1055 }
 0x44e   : > { %v613_v21 = vmul.f32 %v1056_v19, %v1050_v5 }
 0x450   : > { %v614_v22 = vpack.c.bf16 %v613_v21, %v613_v21 }
 0x452   : > { %999 = vmatmul.mubr.msk.bf16.vlgmr.msra.gmra.mrb[8].mxu0 %vm329_vm1, %v614_v22 }
 0x453   : > { %1009 = vmatpush3.bf16.msra.mxu0 %v731_v23  ;;  %1010 = vmatprep.mubr.msk.bf16.mxu0 %vm1084_vm0, %v1083_v0 }
 0x455   : > { %v1058_v24 = vpop.eup %1057 }
 0x456   : > { %v725_v25 = vmul.f32 %v1058_v24, %v1052_v7 }
 0x458   : > { %v726_v26 = vpack.c.bf16 %v725_v25, %v725_v25 }
 0x45a   : > { %1011 = vmatmul.mubr.msk.bf16.vlgmr.msra.gmra.mrb[12].mxu0 %vm329_vm1, %v726_v26 }
 0x51d   : > { %v543_v27 = vpop.f32.mrb[4].mxu0 }
 0x51e   : > { %774 = vrot.lane.b32.xlu0 %v543_v27, %s1085_s6  ;;  %v988_v28 = vpop.f32.mrb[5].mxu0 }
 0x51f   : > { %v546_v29 = vpop.f32.mrb[6].mxu0 }
 0x520   : > { %v989_v30 = vpop.f32.mrb[7].mxu0 }
 0x525   : > { %v655_v31 = vpop.f32.mrb[8].mxu0 }
 0x526   : > { %778 = vrot.lane.b32.xlu1 %v655_v31, %s1086_s7  ;;  %v1000_v33 = vpop.f32.mrb[9].mxu0 }
 0x527   : > { %v658_v34 = vpop.f32.mrb[10].mxu0 }
 0x528   : > { %v1001_v35 = vpop.f32.mrb[11].mxu0 }
 0x52d   : > { %v767_v36 = vpop.f32.mrb[12].mxu0 }
 0x52e   : > { %782 = vrot.lane.b32.xlu1 %v767_v36, %s1087_s8  ;;  %v1012_v0 = vpop.f32.mrb[13].mxu0 }
 0x52f   : > { %v770_v37 = vpop.f32.mrb[14].mxu0 }
 0x530   : > { %v1013_v38 = vpop.f32.mrb[15].mxu0 }
 0x590   : > { %v775_v39 = vpop.permute.xlu0 %774 }
 0x591   : > { %v785_v41 = vsel %vm329_vm1, %v1195_v32, %v775_v39 }
 0x598   : > { %v779_v40 = vpop.permute.xlu1 %778 }
 0x599   : > { %v787_v42 = vsel %vm786_vm3, %v785_v41, %v779_v40 }
 0x5a0   : > { %v783_v43 = vpop.permute.xlu1 %782 }
 0x5a1   : > { %v789_v44 = vsel %vm788_vm4, %v787_v42, %v783_v43 }
 0x5a2   : > { %v790_v45 = vpack.c.bf16 %v789_v44, %v789_v44 }
 0x5a4   : > { %792 = vst.msk [vmem:[%s317_s12] sm:$0xf] %vm791_vm5, %v790_v45 }
 0x5a5 PF: > { %s14_s17 = sadd.s32 1, %s1081_s17   ;;  %s1241_s15 = smov %s1077_s16 }
 0x5a6   : > { %p11_p5 = scmp.ge.s32.totalorder %s14_s17, 4   ;;  %s1242_s16 = smov %s1244_s18 }
 0x5a8   :  { %13 = sbr.rel (!%p11_p5) target bundleno = 2 (0x2), region = 84 }

// kernel: bert_for_sequence_classification.13
= control target key start
LH: loop header
LB: loop body
LE: loop exit
PB: predicated region body
PF: predicated region fallthrough
CT: control target
= control target key end

     0   :  { %vm31_vm0 = vcmask 261120   ;;  %v357_v0 = vmov 0.0   ;;  %vm358_vm1 = vmmov 0   ;;  %vm162_vm2 = vcmask 523264   ;;  %s450_s1 = inlined_call_operand.vmem [shape: bf16[32,64], index: 1, kind: input, shape index: {}]   ;;  %s451_s0 = inlined_call_operand.vmem [shape: bf16[16,32], index: 0, kind: input, shape index: {}]   ;;  %s452_s3 = inlined_call_operand.vmem [shape: bf16[64,32], index: 3, kind: input, shape index: {}]   ;;  %s453_s2 = inlined_call_operand.vmem [shape: f32[1,64], index: 2, kind: input, shape index: {}]   ;;  %s454_s4 = inlined_call_operand.vmem [shape: f32[1,32], index: 4, kind: input, shape index: {}]   ;;  %s455_s5 = inlined_call_operand.vmem [shape: f32[1,32], index: 5, kind: input, shape index: {}]   ;;  %s456_s6 = inlined_call_operand.vmem [shape: f32[1,32], index: 6, kind: input, shape index: {}]   ;;  %s457_s7 = inlined_call_operand.vmem [shape: bf16[16,32], index: 7, kind: output, shape index: {}]  }
   0x1   :  { %320 = vmatprep.subr.bf16.mxu0 %v357_v0  ;;  %v342_v1 = vld [vmem:[%s450_s1] sm:$0xff]   ;;  %324 = vmatprep.mubr.msk.bf16.mxu0 %vm358_vm1, %v357_v0  ;;  %32 = vst.msk [vmem:[#allocation2] sm:$0xff] %vm31_vm0, %v357_v0  ;;  %33 = vst.msk [vmem:[#allocation2 + $0x8] sm:$0xff] %vm31_vm0, %v357_v0  ;;  %v343_v2 = vld [vmem:[%s450_s1 + $0x8] sm:$0xff]   ;;  %vm284_vm3 = vcmask 257024  }
   0x2   :  { %328 = vmatprep.subr.bf16.mxu1 %v357_v0  ;;  %336 = vmatprep.mubr.msk.bf16.mxu1 %vm358_vm1, %v357_v0  ;;  %v344_v3 = vld [vmem:[%s451_s0] sm:$0xff]   ;;  %v346_v5 = vld [vmem:[%s452_s3 + $0x8] sm:$0xff]   ;;  %v347_v6 = vld [vmem:[%s452_s3 + $0x10] sm:$0xff]  }
   0x3   :  { %321 = vmatpush3.bf16.msra.mxu0 %v342_v1  ;;  %v345_v4 = vld [vmem:[%s452_s3] sm:$0xff]   ;;  %v348_v7 = vld [vmem:[%s452_s3 + $0x18] sm:$0xff]  }
   0x4   :  { %322 = vmatprep.subr.bf16.mxu0 %v357_v0  ;;  %329 = vmatpush3.bf16.msra.mxu1 %v345_v4  ;;  %v291_v8 = vld [vmem:[%s453_s2] ss:$0 sm:$0xff] }
   0x5   :  { %330 = vmatprep.subr.bf16.mxu1 %v357_v0  ;;  %v309_v42 = vld [vmem:[%s451_s0] sm:$0xff]  }
   0x6   :  { %v301_v43 = vld [vmem:[%s454_s4] ss:$0 sm:$0xff]  ;;  %v310_v44 = vunpack.c.l.bf16 %v309_v42  ;;  %v311_v47 = vunpack.c.h.bf16 %v309_v42 }
   0x7   :  { %323 = vmatpush3.bf16.msra.mxu0 %v343_v2 }
   0x8   :  { %331 = vmatpush3.bf16.msra.mxu1 %v346_v5  ;;  %v127_v34 = vld [vmem:[#allocation2] sm:$0xff]  ;;  %v128_v36 = vld [vmem:[#allocation2 + $0x8] sm:$0xff] }
   0x9   :  { %332 = vmatprep.subr.bf16.mxu1 %v357_v0 }
   0xa   :  { %325 = vmatmul.mubr.msk.bf16.vlgmr.msra.gmra.mrb[0].mxu0 %vm31_vm0, %v344_v3 }
   0xc   :  { %333 = vmatpush3.bf16.msra.mxu1 %v347_v6 }
   0xd   :  { %334 = vmatprep.subr.bf16.mxu1 %v357_v0 }
  0x10   :  { %335 = vmatpush3.bf16.msra.mxu1 %v348_v7  ;;  %v302_v7 = vld [vmem:[%s455_s5] ss:$0 sm:$0xff] }
  0xdd   :  { %v102_v9 = vpop.f32.mrb[0].mxu0 }
  0xde   :  { %v103_v10 = vadd.f32 %v291_v8, %v102_v9  ;;  %v326_v11 = vpop.f32.mrb[1].mxu0  ;;  %v303_v9 = vld [vmem:[%s456_s6] ss:$0 sm:$0xff] }
  0xdf   :  { %v105_v12 = vpop.f32.mrb[2].mxu0 }
  0xe0   :  { %v109_v13 = vmul.f32 %v103_v10, %v103_v10  ;;  %v106_v14 = vadd.f32 %v291_v8, %v105_v12  ;;  %v327_v15 = vpop.f32.mrb[3].mxu0 }
  0xe2   :  { %v111_v16 = vmul.f32 %v109_v13, %v103_v10  ;;  %v110_v17 = vmul.f32 %v106_v14, %v106_v14 }
  0xe4   :  { %v113_v18 = vmul.f32 0.044715, %v111_v16  ;;  %v112_v19 = vmul.f32 %v110_v17, %v106_v14 }
  0xe6   :  { %v115_v20 = vadd.f32 %v113_v18, %v103_v10  ;;  %v114_v21 = vmul.f32 0.044715, %v112_v19 }
  0xe8   :  { %v117_v22 = vmul.f32 0.7978846, %v115_v20  ;;  %v116_v23 = vadd.f32 %v114_v21, %v106_v14 }
  0xea   :  { %349 = vtanh.f32 %v117_v22  ;;  %v118_v24 = vmul.f32 0.7978846, %v116_v23 }
  0xec   :  { %351 = vtanh.f32 %v118_v24 }
  0xf4   :  { %v350_v25 = vpop.eup %349 }
  0xf5   :  { %v121_v26 = vadd.f32 1.0, %v350_v25 }
  0xf6   :  { %v352_v27 = vpop.eup %351 }
  0xf7   :  { %v123_v28 = vmul.f32 0.5, %v121_v26  ;;  %v122_v29 = vadd.f32 1.0, %v352_v27 }
  0xf9   :  { %v124_v30 = vmul.f32 0.5, %v122_v29  ;;  %v125_v31 = vmul.f32 %v123_v28, %v103_v10 }
  0xfb   :  { %v126_v32 = vmul.f32 %v124_v30, %v106_v14 }
  0xfd   :  { %v129_v33 = vpack.c.bf16 %v126_v32, %v125_v31 }
  0xff   :  { %337 = vmatmul.mubr.msk.bf16.vlgmr.msra.gmra.mrb[0].mxu1 %vm162_vm2, %v129_v33 }
 0x1d2   :  { %v200_v35 = vpop.f32.mrb[0].mxu1 }
 0x1d3   :  { %v207_v37 = vadd.f32 %v200_v35, %v127_v34  ;;  %v338_v38 = vpop.f32.mrb[1].mxu1 }
 0x1d4   :  { %v203_v39 = vpop.f32.mrb[2].mxu1 }
 0x1d5   :  { %209 = vst.msk [vmem:[#allocation2] sm:$0xff] %vm31_vm0, %v207_v37  ;;  %v208_v40 = vadd.f32 %v203_v39, %v128_v36  ;;  %v339_v41 = vpop.f32.mrb[3].mxu1 }
 0x1d7   :  { %210 = vst.msk [vmem:[#allocation2 + $0x8] sm:$0xff] %vm31_vm0, %v208_v40 }
 0x1dc   :  { %v214_v45 = vld [vmem:[#allocation2] sm:$0xff] }
 0x1dd   :  { %v223_v46 = vadd.f32 %v301_v43, %v214_v45 }
 0x1de   :  { %v215_v48 = vld [vmem:[#allocation2 + $0x8] sm:$0xff] }
 0x1df   :  { %v229_v49 = vadd.f32 %v310_v44, %v223_v46  ;;  %v224_v50 = vadd.f32 %v301_v43, %v215_v48 }
 0x1e1   :  { %v231_v51 = vsel %vm31_vm0, %v229_v49, 0.0  ;;  %v230_v52 = vadd.f32 %v311_v47, %v224_v50 }
 0x1e2   :  { %232 = vadd.xlane.f32.xlu0 %v231_v51 }
 0x1e3   :  { %v234_v53 = vsel %vm31_vm0, %v230_v52, 0.0 }
 0x1e6   :  { %235 = vadd.xlane.f32.xlu0 %v234_v53 }
 0x26f   :  { %v233_v54 = vpop.xlane.xlu0 %232 }
 0x270   :  { %v238_v55 = vmul.f32 0.03125, %v233_v54 }
 0x272   :  { %v240_v56 = vsub.f32 %v229_v49, %v238_v55 }
 0x273   :  { %v236_v57 = vpop.xlane.xlu0 %235 }
 0x274   :  { %v239_v58 = vmul.f32 0.03125, %v236_v57  ;;  %v242_v59 = vmul.f32 %v240_v56, %v240_v56 }
 0x276   :  { %v241_v60 = vsub.f32 %v230_v52, %v239_v58  ;;  %v244_v61 = vsel %vm31_vm0, %v242_v59, 0.0 }
 0x277   :  { %245 = vadd.xlane.f32.xlu1 %v244_v61 }
 0x278   :  { %v243_v62 = vmul.f32 %v241_v60, %v241_v60 }
 0x27a   :  { %v247_v63 = vsel %vm31_vm0, %v243_v62, 0.0 }
 0x27b   :  { %248 = vadd.xlane.f32.xlu1 %v247_v63 }
 0x304   :  { %v246_v0 = vpop.xlane.xlu1 %245 }
 0x305   :  { %v250_v1 = vmul.f32 0.03125, %v246_v0 }
 0x307   :  { %v252_v2 = vadd.f32 1e-12, %v250_v1 }
 0x308   :  { %v249_v3 = vpop.xlane.xlu1 %248 }
 0x309   :  { %353 = vrsqrt.f32 %v252_v2  ;;  %v251_v4 = vmul.f32 0.03125, %v249_v3 }
 0x30b   :  { %v253_v5 = vadd.f32 1e-12, %v251_v4 }
 0x30d   :  { %355 = vrsqrt.f32 %v253_v5 }
 0x313   :  { %v354_v6 = vpop.eup %353 }
 0x314   :  { %v256_v8 = vmul.f32 %v354_v6, %v240_v56 }
 0x316   :  { %v265_v10 = vmul.f32 %v302_v7, %v256_v8 }
 0x317   :  { %v356_v11 = vpop.eup %355 }
 0x318   :  { %v274_v12 = vadd.f32 %v303_v9, %v265_v10  ;;  %v257_v13 = vmul.f32 %v356_v11, %v241_v60 }
 0x31a   :  { %v306_v14 = vpack.c.bf16 %v274_v12, %v274_v12  ;;  %v266_v15 = vmul.f32 %v302_v7, %v257_v13 }
 0x31c   :  { %285 = vst.msk [vmem:[%s457_s7] sm:$0xf] %vm284_vm3, %v306_v14  ;;  %v275_v16 = vadd.f32 %v303_v9, %v266_v15 }
 0x31e   :  { %v307_v17 = vpack.c.bf16 %v275_v16, %v275_v16 }
 0x320   :  { %286 = vst.msk [vmem:[%s457_s7 + $0x4] sm:$0xf] %vm284_vm3, %v307_v17 }

</bundles_post_ra>
